<compile_context>
chip_gen: v6e
topology: v6e:2x2x1
jax: 0.10.0
libtpu: 0.0.40
codegen_flags: <defaults>
</compile_context>

<pallas_src>
import math
from functools import partial

import jax
import jax.numpy as jnp
from jax import lax
from jax.experimental import pallas as pl
from jax.experimental.pallas import tpu as pltpu


def _attn_kernel(q_ref, k_ref, v_ref, w_ref, b_ref, o_ref, *, n_heads, d_k,
                 inv_scale):
    """q/k/v_ref: (tile, HD) row-major blocks; w_ref: (3, HD, HD) weights in
    (out, in) layout; b_ref: (3, HD, 1) bias columns; o_ref: (HD, tile)."""
    hd = n_heads * d_k
    tn = q_ref.shape[0]

    # A(out,in) @ B(tile,in)^T -> (out, tile): folds the transpose into the MXU
    # matmul, positions land on the lane axis (lane-dense for everything below).
    dn = (((1,), (1,)), ((), ()))
    x1t = lax.dot_general(w_ref[0], q_ref[...], dn,
                          preferred_element_type=jnp.float32) + b_ref[0]
    x2t = lax.dot_general(w_ref[1], k_ref[...], dn,
                          preferred_element_type=jnp.float32) + b_ref[1]
    x3t = lax.dot_general(w_ref[2], v_ref[...], dn,
                          preferred_element_type=jnp.float32) + b_ref[2]

    # Per-position head tensors, transposed: (H, Dk, tile)
    x1h = x1t.reshape(n_heads, d_k, tn)
    x2h = x2t.reshape(n_heads, d_k, tn)
    x3h = x3t.reshape(n_heads, d_k, tn)

    # scores[h, g, n] = sum_d x1h[h,d,n] * x2h[g,d,n]
    # Unrolled accumulation over d (VPU only): no (H,H,Dk,tile) materialization
    # and no cross-sublane XLU reduce.
    x1d = [x1h[:, d, :] for d in range(d_k)]          # Dk x (H, tile)
    sc = []
    for g in range(n_heads):
        acc = x1d[0] * x2h[g, 0:1, :]
        for d in range(1, d_k):
            acc = acc + x1d[d] * x2h[g, d:d + 1, :]
        sc.append(acc * inv_scale)                    # (H, tile) per g

    # Numerically-stable softmax over g, elementwise-only (unrolled max / sum).
    m = sc[0]
    for g in range(1, n_heads):
        m = jnp.maximum(m, sc[g])
    e = [jnp.exp(s - m) for s in sc]
    l = e[0]
    for g in range(1, n_heads):
        l = l + e[g]
    r = pl.reciprocal(l, approx=True)   # EUP slot (otherwise idle)
    r = r * (2.0 - l * r)               # one Newton step -> ~full f32 precision

    # dropout1 / dropout2 are identity in eval/inference mode.
    # TODO(synk): training-mode dropout (with p=dropout_p) not implemented.

    # out[h, d, n] = sum_g p[h,g,n] * x3h[g,d,n], accumulated over g.
    out = None
    for g in range(n_heads):
        pg = e[g] * r                                       # (H, tile)
        term = pg[:, None, :] * x3h[g][None, :, :]          # (H, Dk, tile)
        out = term if out is None else out + term

    o_ref[...] = out.reshape(hd, tn)


def _cdiv(a, b):
    return -(-a // b)


def _pick_tile_n(N, hd, n_heads, requested,
                 vmem_budget_bytes=22 * 1024 * 1024):
    """VMEM-aware lane-tile choice; prefers >=2 grid steps (v7x megacore) and
    modest padding waste."""
    if requested is not None:
        assert requested % 128 == 0, "tile_n must be a multiple of 128"
        return requested
    # Rough per-position VMEM bytes: 3x double-buffered inputs + double-buffered
    # output + projected features + score/exp intermediates + slack.
    per_pos = 4 * (14 * hd + 2 * n_heads * n_heads) + 512
    candidates = [t for t in (8192, 4096, 2048, 1024, 512, 256, 128)
                  if t * per_pos <= vmem_budget_bytes]
    if not candidates:
        candidates = [128]
    # Largest tile giving >=2 grid steps with <=12.5% padding waste.
    for t in candidates:
        steps = _cdiv(N, t)
        if steps >= 2 and (steps * t - N) * 8 <= N:
            return t
    for t in candidates:
        if _cdiv(N, t) >= 2:
            return t
    return candidates[-1]


def model_forward(q, k, v, params, *, n_heads, d_k, scale_factor, tile_n=None):
    """q, k, v: (B, S, d_model). Returns (B, S, n_heads * d_k)."""
    w1t, b1, w2t, b2, w3t, b3 = params
    B, S, D = q.shape
    HD = n_heads * d_k
    assert D == HD and w3t.shape == (HD, HD), \
        "the original module's .view() requires d_model == n_heads * d_k"
    N = B * S

    # Row-major (N, HD) views (free reshapes; no concat / transpose HBM pass).
    q2 = q.reshape(N, HD).astype(jnp.float32)
    k2 = k.reshape(N, HD).astype(jnp.float32)
    v2 = v.reshape(N, HD).astype(jnp.float32)

    tile = _pick_tile_n(N, HD, n_heads, tile_n)
    Npad = tile * _cdiv(N, tile)
    if Npad != N:
        pad = ((0, Npad - N), (0, 0))
        q2 = jnp.pad(q2, pad)
        k2 = jnp.pad(k2, pad)
        v2 = jnp.pad(v2, pad)

    # Tiny parameter repack (weights in PyTorch (out, in) layout, bias columns).
    wstack = jnp.stack([w1t.T, w2t.T, w3t.T]).astype(jnp.float32)     # (3, HD, HD)
    bstack = jnp.stack([b1.reshape(HD, 1), b2.reshape(HD, 1),
                        b3.reshape(HD, 1)]).astype(jnp.float32)       # (3, HD, 1)

    grid = (Npad // tile,)

    outT = pl.pallas_call(
        partial(_attn_kernel, n_heads=n_heads, d_k=d_k,
                inv_scale=1.0 / float(scale_factor)),
        out_shape=jax.ShapeDtypeStruct((HD, Npad), jnp.float32),
        grid=grid,
        in_specs=[pl.BlockSpec((tile, HD), lambda i: (i, 0)),     # q (row-major)
                  pl.BlockSpec((tile, HD), lambda i: (i, 0)),     # k (row-major)
                  pl.BlockSpec((tile, HD), lambda i: (i, 0)),     # v (row-major)
                  pl.BlockSpec((3, HD, HD), lambda i: (0, 0, 0)),  # weights
                  pl.BlockSpec((3, HD, 1), lambda i: (0, 0, 0))],  # biases
        out_specs=pl.BlockSpec((HD, tile), lambda i: (0, i)),     # lane-dense out
        compiler_params=pltpu.CompilerParams(
            dimension_semantics=("parallel",),
            vmem_limit_bytes=32 * 1024 * 1024),
    )(q2, k2, v2, wstack, bstack)

    # Drop padded tail, back to row-major (B, S, HD).
    return outT[:, :N].T.reshape(B, S, HD)


def reference_forward(q, k, v, params, *, n_heads, d_k, scale_factor):
    w1t, b1, w2t, b2, w3t, b3 = params
    B, S, _ = q.shape
    x1 = (q @ w1t + b1).reshape(B, S, n_heads, d_k)
    x2 = (k @ w2t + b2).reshape(B, S, n_heads, d_k)
    x3 = (v @ w3t + b3).reshape(B, S, n_heads, d_k)
    qk = jnp.einsum('bshd,bsgd->bshg', x1, x2) / scale_factor
    p = jax.nn.softmax(qk, axis=-1)
    return jnp.einsum('bshg,bsgd->bshd', p, x3).reshape(B, S, n_heads * d_k)


if __name__ == "__main__":
    # Hyperparameters: d_model must equal n_heads * d_k for the .view() in the
    # original module to be valid.
    n_heads = 4
    d_k = 8
    d_model = n_heads * d_k          # 32
    scale_factor = math.sqrt(d_k)

    B, S = 2, 8

    key = jax.random.PRNGKey(0)
    kq, kk, kv, kw1, kb1, kw2, kb2, kw3, kb3 = jax.random.split(key, 9)

    q = jax.random.normal(kq, (B, S, d_model), dtype=jnp.float32)
    k = jax.random.normal(kk, (B, S, d_model), dtype=jnp.float32)
    v = jax.random.normal(kv, (B, S, n_heads * d_k), dtype=jnp.float32)

    # Deterministic parameter init. PyTorch Linear stores W as (out, in); we
    # pre-transpose to (in, out) here to keep the reference simple. Biases (1, out).
    def make_linear(kw, kb, in_f, out_f):
        w = 0.1 * jax.random.normal(kw, (out_f, in_f), dtype=jnp.float32)
        b = 0.1 * jax.random.normal(kb, (out_f,), dtype=jnp.float32)
        return w.T, b.reshape(1, out_f)

    w1t, b1 = make_linear(kw1, kb1, d_model, n_heads * d_k)
    w2t, b2 = make_linear(kw2, kb2, d_model, n_heads * d_k)
    w3t, b3 = make_linear(kw3, kb3, n_heads * d_k, d_model)
    params = (w1t, b1, w2t, b2, w3t, b3)

    out = model_forward(q, k, v, params, n_heads=n_heads, d_k=d_k,
                        scale_factor=scale_factor)
    out = jax.block_until_ready(out)

    ref = reference_forward(q, k, v, params, n_heads=n_heads, d_k=d_k,
                            scale_factor=scale_factor)
    assert out.shape == (B, S, n_heads * d_k)
    assert jnp.allclose(out, ref, atol=1e-4, rtol=1e-4)

    print("KERNEL_OK")
</pallas_src>

<mosaic_0001>
module attributes {stable_mosaic.version = 11 : i64} {
  func.func @_attn_kernel(%arg0: i32, %arg1: memref<128x32xf32, #tpu.memory_space<vmem>>, %arg2: memref<128x32xf32, #tpu.memory_space<vmem>>, %arg3: memref<128x32xf32, #tpu.memory_space<vmem>>, %arg4: memref<3x32x32xf32, #tpu.memory_space<vmem>>, %arg5: memref<3x32x1xf32, #tpu.memory_space<vmem>>, %arg6: memref<32x128xf32, #tpu.memory_space<vmem>>) attributes {dimension_semantics = [#tpu.dimension_semantics<parallel>], iteration_bounds = array<i64: 1>, scalar_prefetch = 0 : i64, scratch_operands = 0 : i64, tpu.core_type = #tpu.core_type<tc>, window_params = [{transform_indices = @transform_0, window_bounds = array<i64: 128, 32>}, {transform_indices = @transform_1, window_bounds = array<i64: 128, 32>}, {transform_indices = @transform_2, window_bounds = array<i64: 128, 32>}, {pipeline_mode = #tpu.pipeline_mode<synchronous>, transform_indices = @transform_3, window_bounds = array<i64: 3, 32, 32>}, {pipeline_mode = #tpu.pipeline_mode<synchronous>, transform_indices = @transform_4, window_bounds = array<i64: 3, 32, 1>}, {transform_indices = @transform_5, window_bounds = array<i64: 32, 128>}]} {
    %c0 = arith.constant 0 : index
    %c0_0 = arith.constant 0 : index
    %c0_1 = arith.constant 0 : index
    %0 = vector.load %arg4[%c0, %c0_0, %c0_1] : memref<3x32x32xf32, #tpu.memory_space<vmem>>, vector<1x32x32xf32>
    %1 = vector.shape_cast %0 : vector<1x32x32xf32> to vector<32x32xf32>
    %c0_2 = arith.constant 0 : index
    %c0_3 = arith.constant 0 : index
    %2 = vector.load %arg1[%c0_2, %c0_3] : memref<128x32xf32, #tpu.memory_space<vmem>>, vector<128x32xf32>
    %cst = arith.constant dense<0.000000e+00> : vector<32x128xf32>
    %3 = tpu.matmul %1, %2, %cst {dimension_numbers = #tpu.dot_dimension_numbers<[1], [1], [0], [0], [0, 0, 1, 0], [], []>} : vector<32x32xf32>, vector<128x32xf32>, vector<32x128xf32> -> vector<32x128xf32>
    %c0_4 = arith.constant 0 : index
    %c0_5 = arith.constant 0 : index
    %c0_6 = arith.constant 0 : index
    %4 = vector.load %arg5[%c0_4, %c0_5, %c0_6] : memref<3x32x1xf32, #tpu.memory_space<vmem>>, vector<1x32x1xf32>
    %5 = vector.shape_cast %4 : vector<1x32x1xf32> to vector<32x1xf32>
    %6 = vector.broadcast %5 : vector<32x1xf32> to vector<32x128xf32>
    %7 = arith.addf %3, %6 : vector<32x128xf32>
    %c1 = arith.constant 1 : index
    %c0_7 = arith.constant 0 : index
    %c0_8 = arith.constant 0 : index
    %8 = vector.load %arg4[%c1, %c0_7, %c0_8] : memref<3x32x32xf32, #tpu.memory_space<vmem>>, vector<1x32x32xf32>
    %9 = vector.shape_cast %8 : vector<1x32x32xf32> to vector<32x32xf32>
    %c0_9 = arith.constant 0 : index
    %c0_10 = arith.constant 0 : index
    %10 = vector.load %arg2[%c0_9, %c0_10] : memref<128x32xf32, #tpu.memory_space<vmem>>, vector<128x32xf32>
    %cst_11 = arith.constant dense<0.000000e+00> : vector<32x128xf32>
    %11 = tpu.matmul %9, %10, %cst_11 {dimension_numbers = #tpu.dot_dimension_numbers<[1], [1], [0], [0], [0, 0, 1, 0], [], []>} : vector<32x32xf32>, vector<128x32xf32>, vector<32x128xf32> -> vector<32x128xf32>
    %c1_12 = arith.constant 1 : index
    %c0_13 = arith.constant 0 : index
    %c0_14 = arith.constant 0 : index
    %12 = vector.load %arg5[%c1_12, %c0_13, %c0_14] : memref<3x32x1xf32, #tpu.memory_space<vmem>>, vector<1x32x1xf32>
    %13 = vector.shape_cast %12 : vector<1x32x1xf32> to vector<32x1xf32>
    %14 = vector.broadcast %13 : vector<32x1xf32> to vector<32x128xf32>
    %15 = arith.addf %11, %14 : vector<32x128xf32>
    %c2 = arith.constant 2 : index
    %c0_15 = arith.constant 0 : index
    %c0_16 = arith.constant 0 : index
    %16 = vector.load %arg4[%c2, %c0_15, %c0_16] : memref<3x32x32xf32, #tpu.memory_space<vmem>>, vector<1x32x32xf32>
    %17 = vector.shape_cast %16 : vector<1x32x32xf32> to vector<32x32xf32>
    %c0_17 = arith.constant 0 : index
    %c0_18 = arith.constant 0 : index
    %18 = vector.load %arg3[%c0_17, %c0_18] : memref<128x32xf32, #tpu.memory_space<vmem>>, vector<128x32xf32>
    %cst_19 = arith.constant dense<0.000000e+00> : vector<32x128xf32>
    %19 = tpu.matmul %17, %18, %cst_19 {dimension_numbers = #tpu.dot_dimension_numbers<[1], [1], [0], [0], [0, 0, 1, 0], [], []>} : vector<32x32xf32>, vector<128x32xf32>, vector<32x128xf32> -> vector<32x128xf32>
    %c2_20 = arith.constant 2 : index
    %c0_21 = arith.constant 0 : index
    %c0_22 = arith.constant 0 : index
    %20 = vector.load %arg5[%c2_20, %c0_21, %c0_22] : memref<3x32x1xf32, #tpu.memory_space<vmem>>, vector<1x32x1xf32>
    %21 = vector.shape_cast %20 : vector<1x32x1xf32> to vector<32x1xf32>
    %22 = vector.broadcast %21 : vector<32x1xf32> to vector<32x128xf32>
    %23 = arith.addf %19, %22 : vector<32x128xf32>
    %24 = vector.shape_cast %7 : vector<32x128xf32> to vector<4x8x128xf32>
    %25 = vector.shape_cast %15 : vector<32x128xf32> to vector<4x8x128xf32>
    %26 = vector.shape_cast %23 : vector<32x128xf32> to vector<4x8x128xf32>
    %27 = vector.extract_strided_slice %24 {offsets = [0, 0, 0], sizes = [4, 1, 128], strides = [1, 1, 1]} : vector<4x8x128xf32> to vector<4x1x128xf32>
    %28 = vector.shape_cast %27 : vector<4x1x128xf32> to vector<4x128xf32>
    %29 = vector.extract_strided_slice %24 {offsets = [0, 1, 0], sizes = [4, 1, 128], strides = [1, 1, 1]} : vector<4x8x128xf32> to vector<4x1x128xf32>
    %30 = vector.shape_cast %29 : vector<4x1x128xf32> to vector<4x128xf32>
    %31 = vector.extract_strided_slice %24 {offsets = [0, 2, 0], sizes = [4, 1, 128], strides = [1, 1, 1]} : vector<4x8x128xf32> to vector<4x1x128xf32>
    %32 = vector.shape_cast %31 : vector<4x1x128xf32> to vector<4x128xf32>
    %33 = vector.extract_strided_slice %24 {offsets = [0, 3, 0], sizes = [4, 1, 128], strides = [1, 1, 1]} : vector<4x8x128xf32> to vector<4x1x128xf32>
    %34 = vector.shape_cast %33 : vector<4x1x128xf32> to vector<4x128xf32>
    %35 = vector.extract_strided_slice %24 {offsets = [0, 4, 0], sizes = [4, 1, 128], strides = [1, 1, 1]} : vector<4x8x128xf32> to vector<4x1x128xf32>
    %36 = vector.shape_cast %35 : vector<4x1x128xf32> to vector<4x128xf32>
    %37 = vector.extract_strided_slice %24 {offsets = [0, 5, 0], sizes = [4, 1, 128], strides = [1, 1, 1]} : vector<4x8x128xf32> to vector<4x1x128xf32>
    %38 = vector.shape_cast %37 : vector<4x1x128xf32> to vector<4x128xf32>
    %39 = vector.extract_strided_slice %24 {offsets = [0, 6, 0], sizes = [4, 1, 128], strides = [1, 1, 1]} : vector<4x8x128xf32> to vector<4x1x128xf32>
    %40 = vector.shape_cast %39 : vector<4x1x128xf32> to vector<4x128xf32>
    %41 = vector.extract_strided_slice %24 {offsets = [0, 7, 0], sizes = [4, 1, 128], strides = [1, 1, 1]} : vector<4x8x128xf32> to vector<4x1x128xf32>
    %42 = vector.shape_cast %41 : vector<4x1x128xf32> to vector<4x128xf32>
    %43 = vector.extract_strided_slice %25 {offsets = [0, 0, 0], sizes = [1, 1, 128], strides = [1, 1, 1]} : vector<4x8x128xf32> to vector<1x1x128xf32>
    %44 = vector.shape_cast %43 : vector<1x1x128xf32> to vector<1x128xf32>
    %45 = vector.broadcast %44 : vector<1x128xf32> to vector<4x128xf32>
    %46 = arith.mulf %28, %45 : vector<4x128xf32>
    %47 = vector.extract_strided_slice %25 {offsets = [0, 1, 0], sizes = [1, 1, 128], strides = [1, 1, 1]} : vector<4x8x128xf32> to vector<1x1x128xf32>
    %48 = vector.shape_cast %47 : vector<1x1x128xf32> to vector<1x128xf32>
    %49 = vector.broadcast %48 : vector<1x128xf32> to vector<4x128xf32>
    %50 = arith.mulf %30, %49 : vector<4x128xf32>
    %51 = arith.addf %46, %50 : vector<4x128xf32>
    %52 = vector.extract_strided_slice %25 {offsets = [0, 2, 0], sizes = [1, 1, 128], strides = [1, 1, 1]} : vector<4x8x128xf32> to vector<1x1x128xf32>
    %53 = vector.shape_cast %52 : vector<1x1x128xf32> to vector<1x128xf32>
    %54 = vector.broadcast %53 : vector<1x128xf32> to vector<4x128xf32>
    %55 = arith.mulf %32, %54 : vector<4x128xf32>
    %56 = arith.addf %51, %55 : vector<4x128xf32>
    %57 = vector.extract_strided_slice %25 {offsets = [0, 3, 0], sizes = [1, 1, 128], strides = [1, 1, 1]} : vector<4x8x128xf32> to vector<1x1x128xf32>
    %58 = vector.shape_cast %57 : vector<1x1x128xf32> to vector<1x128xf32>
    %59 = vector.broadcast %58 : vector<1x128xf32> to vector<4x128xf32>
    %60 = arith.mulf %34, %59 : vector<4x128xf32>
    %61 = arith.addf %56, %60 : vector<4x128xf32>
    %62 = vector.extract_strided_slice %25 {offsets = [0, 4, 0], sizes = [1, 1, 128], strides = [1, 1, 1]} : vector<4x8x128xf32> to vector<1x1x128xf32>
    %63 = vector.shape_cast %62 : vector<1x1x128xf32> to vector<1x128xf32>
    %64 = vector.broadcast %63 : vector<1x128xf32> to vector<4x128xf32>
    %65 = arith.mulf %36, %64 : vector<4x128xf32>
    %66 = arith.addf %61, %65 : vector<4x128xf32>
    %67 = vector.extract_strided_slice %25 {offsets = [0, 5, 0], sizes = [1, 1, 128], strides = [1, 1, 1]} : vector<4x8x128xf32> to vector<1x1x128xf32>
    %68 = vector.shape_cast %67 : vector<1x1x128xf32> to vector<1x128xf32>
    %69 = vector.broadcast %68 : vector<1x128xf32> to vector<4x128xf32>
    %70 = arith.mulf %38, %69 : vector<4x128xf32>
    %71 = arith.addf %66, %70 : vector<4x128xf32>
    %72 = vector.extract_strided_slice %25 {offsets = [0, 6, 0], sizes = [1, 1, 128], strides = [1, 1, 1]} : vector<4x8x128xf32> to vector<1x1x128xf32>
    %73 = vector.shape_cast %72 : vector<1x1x128xf32> to vector<1x128xf32>
    %74 = vector.broadcast %73 : vector<1x128xf32> to vector<4x128xf32>
    %75 = arith.mulf %40, %74 : vector<4x128xf32>
    %76 = arith.addf %71, %75 : vector<4x128xf32>
    %77 = vector.extract_strided_slice %25 {offsets = [0, 7, 0], sizes = [1, 1, 128], strides = [1, 1, 1]} : vector<4x8x128xf32> to vector<1x1x128xf32>
    %78 = vector.shape_cast %77 : vector<1x1x128xf32> to vector<1x128xf32>
    %79 = vector.broadcast %78 : vector<1x128xf32> to vector<4x128xf32>
    %80 = arith.mulf %42, %79 : vector<4x128xf32>
    %81 = arith.addf %76, %80 : vector<4x128xf32>
    %cst_23 = arith.constant 0.353553385 : f32
    %82 = vector.broadcast %cst_23 : f32 to vector<4x128xf32>
    %83 = arith.mulf %81, %82 : vector<4x128xf32>
    %84 = vector.extract_strided_slice %25 {offsets = [1, 0, 0], sizes = [1, 1, 128], strides = [1, 1, 1]} : vector<4x8x128xf32> to vector<1x1x128xf32>
    %85 = vector.shape_cast %84 : vector<1x1x128xf32> to vector<1x128xf32>
    %86 = vector.broadcast %85 : vector<1x128xf32> to vector<4x128xf32>
    %87 = arith.mulf %28, %86 : vector<4x128xf32>
    %88 = vector.extract_strided_slice %25 {offsets = [1, 1, 0], sizes = [1, 1, 128], strides = [1, 1, 1]} : vector<4x8x128xf32> to vector<1x1x128xf32>
    %89 = vector.shape_cast %88 : vector<1x1x128xf32> to vector<1x128xf32>
    %90 = vector.broadcast %89 : vector<1x128xf32> to vector<4x128xf32>
    %91 = arith.mulf %30, %90 : vector<4x128xf32>
    %92 = arith.addf %87, %91 : vector<4x128xf32>
    %93 = vector.extract_strided_slice %25 {offsets = [1, 2, 0], sizes = [1, 1, 128], strides = [1, 1, 1]} : vector<4x8x128xf32> to vector<1x1x128xf32>
    %94 = vector.shape_cast %93 : vector<1x1x128xf32> to vector<1x128xf32>
    %95 = vector.broadcast %94 : vector<1x128xf32> to vector<4x128xf32>
    %96 = arith.mulf %32, %95 : vector<4x128xf32>
    %97 = arith.addf %92, %96 : vector<4x128xf32>
    %98 = vector.extract_strided_slice %25 {offsets = [1, 3, 0], sizes = [1, 1, 128], strides = [1, 1, 1]} : vector<4x8x128xf32> to vector<1x1x128xf32>
    %99 = vector.shape_cast %98 : vector<1x1x128xf32> to vector<1x128xf32>
    %100 = vector.broadcast %99 : vector<1x128xf32> to vector<4x128xf32>
    %101 = arith.mulf %34, %100 : vector<4x128xf32>
    %102 = arith.addf %97, %101 : vector<4x128xf32>
    %103 = vector.extract_strided_slice %25 {offsets = [1, 4, 0], sizes = [1, 1, 128], strides = [1, 1, 1]} : vector<4x8x128xf32> to vector<1x1x128xf32>
    %104 = vector.shape_cast %103 : vector<1x1x128xf32> to vector<1x128xf32>
    %105 = vector.broadcast %104 : vector<1x128xf32> to vector<4x128xf32>
    %106 = arith.mulf %36, %105 : vector<4x128xf32>
    %107 = arith.addf %102, %106 : vector<4x128xf32>
    %108 = vector.extract_strided_slice %25 {offsets = [1, 5, 0], sizes = [1, 1, 128], strides = [1, 1, 1]} : vector<4x8x128xf32> to vector<1x1x128xf32>
    %109 = vector.shape_cast %108 : vector<1x1x128xf32> to vector<1x128xf32>
    %110 = vector.broadcast %109 : vector<1x128xf32> to vector<4x128xf32>
    %111 = arith.mulf %38, %110 : vector<4x128xf32>
    %112 = arith.addf %107, %111 : vector<4x128xf32>
    %113 = vector.extract_strided_slice %25 {offsets = [1, 6, 0], sizes = [1, 1, 128], strides = [1, 1, 1]} : vector<4x8x128xf32> to vector<1x1x128xf32>
    %114 = vector.shape_cast %113 : vector<1x1x128xf32> to vector<1x128xf32>
    %115 = vector.broadcast %114 : vector<1x128xf32> to vector<4x128xf32>
    %116 = arith.mulf %40, %115 : vector<4x128xf32>
    %117 = arith.addf %112, %116 : vector<4x128xf32>
    %118 = vector.extract_strided_slice %25 {offsets = [1, 7, 0], sizes = [1, 1, 128], strides = [1, 1, 1]} : vector<4x8x128xf32> to vector<1x1x128xf32>
    %119 = vector.shape_cast %118 : vector<1x1x128xf32> to vector<1x128xf32>
    %120 = vector.broadcast %119 : vector<1x128xf32> to vector<4x128xf32>
    %121 = arith.mulf %42, %120 : vector<4x128xf32>
    %122 = arith.addf %117, %121 : vector<4x128xf32>
    %cst_24 = arith.constant 0.353553385 : f32
    %123 = vector.broadcast %cst_24 : f32 to vector<4x128xf32>
    %124 = arith.mulf %122, %123 : vector<4x128xf32>
    %125 = vector.extract_strided_slice %25 {offsets = [2, 0, 0], sizes = [1, 1, 128], strides = [1, 1, 1]} : vector<4x8x128xf32> to vector<1x1x128xf32>
    %126 = vector.shape_cast %125 : vector<1x1x128xf32> to vector<1x128xf32>
    %127 = vector.broadcast %126 : vector<1x128xf32> to vector<4x128xf32>
    %128 = arith.mulf %28, %127 : vector<4x128xf32>
    %129 = vector.extract_strided_slice %25 {offsets = [2, 1, 0], sizes = [1, 1, 128], strides = [1, 1, 1]} : vector<4x8x128xf32> to vector<1x1x128xf32>
    %130 = vector.shape_cast %129 : vector<1x1x128xf32> to vector<1x128xf32>
    %131 = vector.broadcast %130 : vector<1x128xf32> to vector<4x128xf32>
    %132 = arith.mulf %30, %131 : vector<4x128xf32>
    %133 = arith.addf %128, %132 : vector<4x128xf32>
    %134 = vector.extract_strided_slice %25 {offsets = [2, 2, 0], sizes = [1, 1, 128], strides = [1, 1, 1]} : vector<4x8x128xf32> to vector<1x1x128xf32>
    %135 = vector.shape_cast %134 : vector<1x1x128xf32> to vector<1x128xf32>
    %136 = vector.broadcast %135 : vector<1x128xf32> to vector<4x128xf32>
    %137 = arith.mulf %32, %136 : vector<4x128xf32>
    %138 = arith.addf %133, %137 : vector<4x128xf32>
    %139 = vector.extract_strided_slice %25 {offsets = [2, 3, 0], sizes = [1, 1, 128], strides = [1, 1, 1]} : vector<4x8x128xf32> to vector<1x1x128xf32>
    %140 = vector.shape_cast %139 : vector<1x1x128xf32> to vector<1x128xf32>
    %141 = vector.broadcast %140 : vector<1x128xf32> to vector<4x128xf32>
    %142 = arith.mulf %34, %141 : vector<4x128xf32>
    %143 = arith.addf %138, %142 : vector<4x128xf32>
    %144 = vector.extract_strided_slice %25 {offsets = [2, 4, 0], sizes = [1, 1, 128], strides = [1, 1, 1]} : vector<4x8x128xf32> to vector<1x1x128xf32>
    %145 = vector.shape_cast %144 : vector<1x1x128xf32> to vector<1x128xf32>
    %146 = vector.broadcast %145 : vector<1x128xf32> to vector<4x128xf32>
    %147 = arith.mulf %36, %146 : vector<4x128xf32>
    %148 = arith.addf %143, %147 : vector<4x128xf32>
    %149 = vector.extract_strided_slice %25 {offsets = [2, 5, 0], sizes = [1, 1, 128], strides = [1, 1, 1]} : vector<4x8x128xf32> to vector<1x1x128xf32>
    %150 = vector.shape_cast %149 : vector<1x1x128xf32> to vector<1x128xf32>
    %151 = vector.broadcast %150 : vector<1x128xf32> to vector<4x128xf32>
    %152 = arith.mulf %38, %151 : vector<4x128xf32>
    %153 = arith.addf %148, %152 : vector<4x128xf32>
    %154 = vector.extract_strided_slice %25 {offsets = [2, 6, 0], sizes = [1, 1, 128], strides = [1, 1, 1]} : vector<4x8x128xf32> to vector<1x1x128xf32>
    %155 = vector.shape_cast %154 : vector<1x1x128xf32> to vector<1x128xf32>
    %156 = vector.broadcast %155 : vector<1x128xf32> to vector<4x128xf32>
    %157 = arith.mulf %40, %156 : vector<4x128xf32>
    %158 = arith.addf %153, %157 : vector<4x128xf32>
    %159 = vector.extract_strided_slice %25 {offsets = [2, 7, 0], sizes = [1, 1, 128], strides = [1, 1, 1]} : vector<4x8x128xf32> to vector<1x1x128xf32>
    %160 = vector.shape_cast %159 : vector<1x1x128xf32> to vector<1x128xf32>
    %161 = vector.broadcast %160 : vector<1x128xf32> to vector<4x128xf32>
    %162 = arith.mulf %42, %161 : vector<4x128xf32>
    %163 = arith.addf %158, %162 : vector<4x128xf32>
    %cst_25 = arith.constant 0.353553385 : f32
    %164 = vector.broadcast %cst_25 : f32 to vector<4x128xf32>
    %165 = arith.mulf %163, %164 : vector<4x128xf32>
    %166 = vector.extract_strided_slice %25 {offsets = [3, 0, 0], sizes = [1, 1, 128], strides = [1, 1, 1]} : vector<4x8x128xf32> to vector<1x1x128xf32>
    %167 = vector.shape_cast %166 : vector<1x1x128xf32> to vector<1x128xf32>
    %168 = vector.broadcast %167 : vector<1x128xf32> to vector<4x128xf32>
    %169 = arith.mulf %28, %168 : vector<4x128xf32>
    %170 = vector.extract_strided_slice %25 {offsets = [3, 1, 0], sizes = [1, 1, 128], strides = [1, 1, 1]} : vector<4x8x128xf32> to vector<1x1x128xf32>
    %171 = vector.shape_cast %170 : vector<1x1x128xf32> to vector<1x128xf32>
    %172 = vector.broadcast %171 : vector<1x128xf32> to vector<4x128xf32>
    %173 = arith.mulf %30, %172 : vector<4x128xf32>
    %174 = arith.addf %169, %173 : vector<4x128xf32>
    %175 = vector.extract_strided_slice %25 {offsets = [3, 2, 0], sizes = [1, 1, 128], strides = [1, 1, 1]} : vector<4x8x128xf32> to vector<1x1x128xf32>
    %176 = vector.shape_cast %175 : vector<1x1x128xf32> to vector<1x128xf32>
    %177 = vector.broadcast %176 : vector<1x128xf32> to vector<4x128xf32>
    %178 = arith.mulf %32, %177 : vector<4x128xf32>
    %179 = arith.addf %174, %178 : vector<4x128xf32>
    %180 = vector.extract_strided_slice %25 {offsets = [3, 3, 0], sizes = [1, 1, 128], strides = [1, 1, 1]} : vector<4x8x128xf32> to vector<1x1x128xf32>
    %181 = vector.shape_cast %180 : vector<1x1x128xf32> to vector<1x128xf32>
    %182 = vector.broadcast %181 : vector<1x128xf32> to vector<4x128xf32>
    %183 = arith.mulf %34, %182 : vector<4x128xf32>
    %184 = arith.addf %179, %183 : vector<4x128xf32>
    %185 = vector.extract_strided_slice %25 {offsets = [3, 4, 0], sizes = [1, 1, 128], strides = [1, 1, 1]} : vector<4x8x128xf32> to vector<1x1x128xf32>
    %186 = vector.shape_cast %185 : vector<1x1x128xf32> to vector<1x128xf32>
    %187 = vector.broadcast %186 : vector<1x128xf32> to vector<4x128xf32>
    %188 = arith.mulf %36, %187 : vector<4x128xf32>
    %189 = arith.addf %184, %188 : vector<4x128xf32>
    %190 = vector.extract_strided_slice %25 {offsets = [3, 5, 0], sizes = [1, 1, 128], strides = [1, 1, 1]} : vector<4x8x128xf32> to vector<1x1x128xf32>
    %191 = vector.shape_cast %190 : vector<1x1x128xf32> to vector<1x128xf32>
    %192 = vector.broadcast %191 : vector<1x128xf32> to vector<4x128xf32>
    %193 = arith.mulf %38, %192 : vector<4x128xf32>
    %194 = arith.addf %189, %193 : vector<4x128xf32>
    %195 = vector.extract_strided_slice %25 {offsets = [3, 6, 0], sizes = [1, 1, 128], strides = [1, 1, 1]} : vector<4x8x128xf32> to vector<1x1x128xf32>
    %196 = vector.shape_cast %195 : vector<1x1x128xf32> to vector<1x128xf32>
    %197 = vector.broadcast %196 : vector<1x128xf32> to vector<4x128xf32>
    %198 = arith.mulf %40, %197 : vector<4x128xf32>
    %199 = arith.addf %194, %198 : vector<4x128xf32>
    %200 = vector.extract_strided_slice %25 {offsets = [3, 7, 0], sizes = [1, 1, 128], strides = [1, 1, 1]} : vector<4x8x128xf32> to vector<1x1x128xf32>
    %201 = vector.shape_cast %200 : vector<1x1x128xf32> to vector<1x128xf32>
    %202 = vector.broadcast %201 : vector<1x128xf32> to vector<4x128xf32>
    %203 = arith.mulf %42, %202 : vector<4x128xf32>
    %204 = arith.addf %199, %203 : vector<4x128xf32>
    %cst_26 = arith.constant 0.353553385 : f32
    %205 = vector.broadcast %cst_26 : f32 to vector<4x128xf32>
    %206 = arith.mulf %204, %205 : vector<4x128xf32>
    %207 = arith.maximumf %83, %124 : vector<4x128xf32>
    %208 = arith.maximumf %207, %165 : vector<4x128xf32>
    %209 = arith.maximumf %208, %206 : vector<4x128xf32>
    %210 = arith.subf %83, %209 : vector<4x128xf32>
    %211 = math.exp %210 : vector<4x128xf32>
    %212 = arith.subf %124, %209 : vector<4x128xf32>
    %213 = math.exp %212 : vector<4x128xf32>
    %214 = arith.subf %165, %209 : vector<4x128xf32>
    %215 = math.exp %214 : vector<4x128xf32>
    %216 = arith.subf %206, %209 : vector<4x128xf32>
    %217 = math.exp %216 : vector<4x128xf32>
    %218 = arith.addf %211, %213 : vector<4x128xf32>
    %219 = arith.addf %218, %215 : vector<4x128xf32>
    %220 = arith.addf %219, %217 : vector<4x128xf32>
    %221 = tpu.reciprocal %220 {approx = true} : vector<4x128xf32> -> vector<4x128xf32>
    %222 = arith.mulf %220, %221 : vector<4x128xf32>
    %cst_27 = arith.constant 2.000000e+00 : f32
    %223 = vector.broadcast %cst_27 : f32 to vector<4x128xf32>
    %224 = arith.subf %223, %222 : vector<4x128xf32>
    %225 = arith.mulf %221, %224 : vector<4x128xf32>
    %226 = arith.mulf %211, %225 : vector<4x128xf32>
    %227 = vector.shape_cast %226 : vector<4x128xf32> to vector<4x1x128xf32>
    %228 = vector.extract_strided_slice %26 {offsets = [0, 0, 0], sizes = [1, 8, 128], strides = [1, 1, 1]} : vector<4x8x128xf32> to vector<1x8x128xf32>
    %229 = vector.shape_cast %228 : vector<1x8x128xf32> to vector<8x128xf32>
    %230 = vector.shape_cast %229 : vector<8x128xf32> to vector<1x8x128xf32>
    %231 = vector.broadcast %227 : vector<4x1x128xf32> to vector<4x8x128xf32>
    %232 = vector.broadcast %230 : vector<1x8x128xf32> to vector<4x8x128xf32>
    %233 = arith.mulf %231, %232 : vector<4x8x128xf32>
    %234 = arith.mulf %213, %225 : vector<4x128xf32>
    %235 = vector.shape_cast %234 : vector<4x128xf32> to vector<4x1x128xf32>
    %236 = vector.extract_strided_slice %26 {offsets = [1, 0, 0], sizes = [1, 8, 128], strides = [1, 1, 1]} : vector<4x8x128xf32> to vector<1x8x128xf32>
    %237 = vector.shape_cast %236 : vector<1x8x128xf32> to vector<8x128xf32>
    %238 = vector.shape_cast %237 : vector<8x128xf32> to vector<1x8x128xf32>
    %239 = vector.broadcast %235 : vector<4x1x128xf32> to vector<4x8x128xf32>
    %240 = vector.broadcast %238 : vector<1x8x128xf32> to vector<4x8x128xf32>
    %241 = arith.mulf %239, %240 : vector<4x8x128xf32>
    %242 = arith.addf %233, %241 : vector<4x8x128xf32>
    %243 = arith.mulf %215, %225 : vector<4x128xf32>
    %244 = vector.shape_cast %243 : vector<4x128xf32> to vector<4x1x128xf32>
    %245 = vector.extract_strided_slice %26 {offsets = [2, 0, 0], sizes = [1, 8, 128], strides = [1, 1, 1]} : vector<4x8x128xf32> to vector<1x8x128xf32>
    %246 = vector.shape_cast %245 : vector<1x8x128xf32> to vector<8x128xf32>
    %247 = vector.shape_cast %246 : vector<8x128xf32> to vector<1x8x128xf32>
    %248 = vector.broadcast %244 : vector<4x1x128xf32> to vector<4x8x128xf32>
    %249 = vector.broadcast %247 : vector<1x8x128xf32> to vector<4x8x128xf32>
    %250 = arith.mulf %248, %249 : vector<4x8x128xf32>
    %251 = arith.addf %242, %250 : vector<4x8x128xf32>
    %252 = arith.mulf %217, %225 : vector<4x128xf32>
    %253 = vector.shape_cast %252 : vector<4x128xf32> to vector<4x1x128xf32>
    %254 = vector.extract_strided_slice %26 {offsets = [3, 0, 0], sizes = [1, 8, 128], strides = [1, 1, 1]} : vector<4x8x128xf32> to vector<1x8x128xf32>
    %255 = vector.shape_cast %254 : vector<1x8x128xf32> to vector<8x128xf32>
    %256 = vector.shape_cast %255 : vector<8x128xf32> to vector<1x8x128xf32>
    %257 = vector.broadcast %253 : vector<4x1x128xf32> to vector<4x8x128xf32>
    %258 = vector.broadcast %256 : vector<1x8x128xf32> to vector<4x8x128xf32>
    %259 = arith.mulf %257, %258 : vector<4x8x128xf32>
    %260 = arith.addf %251, %259 : vector<4x8x128xf32>
    %261 = vector.shape_cast %260 : vector<4x8x128xf32> to vector<32x128xf32>
    %c0_28 = arith.constant 0 : index
    %c0_29 = arith.constant 0 : index
    %262 = vector.load %arg6[%c0_28, %c0_29] : memref<32x128xf32, #tpu.memory_space<vmem>>, vector<32x128xf32>
    tpu.vector_store %arg6[%c0_28, %c0_29], %261 {strides = array<i32>} : memref<32x128xf32, #tpu.memory_space<vmem>>, vector<32x128xf32>,
    return
  }
  func.func @transform_0(%arg0: i32) -> (i32, i32) {
    %c0_i32 = arith.constant 0 : i32
    %c0_i32_0 = arith.constant 0 : i32
    return %arg0, %c0_i32 : i32, i32
  }
  func.func @transform_1(%arg0: i32) -> (i32, i32) {
    %c0_i32 = arith.constant 0 : i32
    %c0_i32_0 = arith.constant 0 : i32
    return %arg0, %c0_i32 : i32, i32
  }
  func.func @transform_2(%arg0: i32) -> (i32, i32) {
    %c0_i32 = arith.constant 0 : i32
    %c0_i32_0 = arith.constant 0 : i32
    return %arg0, %c0_i32 : i32, i32
  }
  func.func @transform_3(%arg0: i32) -> (i32, i32, i32) {
    %c0_i32 = arith.constant 0 : i32
    %c0_i32_0 = arith.constant 0 : i32
    %c0_i32_1 = arith.constant 0 : i32
    %c0_i32_2 = arith.constant 0 : i32
    return %c0_i32, %c0_i32_0, %c0_i32_1 : i32, i32, i32
  }
  func.func @transform_4(%arg0: i32) -> (i32, i32, i32) {
    %c0_i32 = arith.constant 0 : i32
    %c0_i32_0 = arith.constant 0 : i32
    %c0_i32_1 = arith.constant 0 : i32
    %c0_i32_2 = arith.constant 0 : i32
    return %c0_i32, %c0_i32_0, %c0_i32_1 : i32, i32, i32
  }
  func.func @transform_5(%arg0: i32) -> (i32, i32) {
    %c0_i32 = arith.constant 0 : i32
    %c0_i32_0 = arith.constant 0 : i32
    return %c0_i32, %arg0 : i32, i32
  }
}

</mosaic_0001>

<bundles_post_ra>
// kernel: tpu_custom_call.1
= control target key start
LH: loop header
LB: loop body
LE: loop exit
PB: predicated region body
PF: predicated region fallthrough
CT: control target
= control target key end

     0   :  { %vm65_vm0 = vcmask 261120   ;;  %v1879_v6 = vmov 0   ;;  %s2976_s0 = inlined_call_operand.vmem [shape: f32[128,32], index: 0, kind: input, shape index: {}]   ;;  %s2977_s1 = inlined_call_operand.vmem [shape: f32[128,32], index: 1, kind: input, shape index: {}]   ;;  %s2978_s2 = inlined_call_operand.vmem [shape: f32[128,32], index: 2, kind: input, shape index: {}]   ;;  %s2979_s3 = inlined_call_operand.vmem [shape: f32[3,32,32], index: 3, kind: input, shape index: {}]   ;;  %s2980_s4 = inlined_call_operand.vmem [shape: f32[3,32,1], index: 4, kind: input, shape index: {}]   ;;  %s2981_s5 = inlined_call_operand.hbm [shape: f32[32,128], index: 5, kind: output, shape index: {}]  }
   0x1   :  { %v40_v0 = vld [vmem:[%s2976_s0 + $0x78] sm:$0xff]  ;;  %v39_v2 = vld [vmem:[%s2976_s0 + $0x70] sm:$0xff]  ;;  %v38_v4 = vld [vmem:[%s2976_s0 + $0x68] sm:$0xff]  ;;  %1815 = vset.pattern.permute.xlu0 %v1879_v6  ;;  %1816 = vset.pattern.permute.xlu1 %v1879_v6 }
   0x2   :  { %v231_v1 = vld [vmem:[%s2977_s1 + $0x78] sm:$0xff]  ;;  %1665 = vmatprep.subr.msk.mxu0 %vm65_vm0, %v40_v0  ;;  %v230_v3 = vld [vmem:[%s2977_s1 + $0x70] sm:$0xff]  ;;  %v229_v5 = vld [vmem:[%s2977_s1 + $0x68] sm:$0xff] }
   0x3   :  { %1703 = vmatprep.subr.msk.mxu1 %vm65_vm0, %v231_v1  ;;  %1666 = vmatpush3.xpose.msk.msra.mxu0 %vm65_vm0, %v40_v0  ;;  %v37_v7 = vld [vmem:[%s2976_s0 + $0x60] sm:$0xff]  ;;  %v36_v11 = vld [vmem:[%s2976_s0 + $0x58] sm:$0xff]  ;;  %v35_v13 = vld [vmem:[%s2976_s0 + $0x50] sm:$0xff] }
   0x4   :  { %1704 = vmatpush3.xpose.msk.msra.mxu1 %vm65_vm0, %v231_v1  ;;  %1667 = vmatprep.subr.msk.mxu0 %vm65_vm0, %v39_v2  ;;  %v228_v8 = vld [vmem:[%s2977_s1 + $0x60] sm:$0xff]  ;;  %v227_v12 = vld [vmem:[%s2977_s1 + $0x58] sm:$0xff]  ;;  %v226_v14 = vld [vmem:[%s2977_s1 + $0x50] sm:$0xff] }
   0x5   :  { %1705 = vmatprep.subr.msk.mxu1 %vm65_vm0, %v230_v3  ;;  %v21_v9 = vld [vmem:[%s2979_s3] sm:$0xff]  ;;  %v34_v17 = vld [vmem:[%s2976_s0 + $0x48] sm:$0xff] }
   0x6   :  { %v1549_v10 = vld [vmem:[%s2979_s3 + $0x20] sm:$0xff]  ;;  %1697 = vmatprep.mubr.msk.f32.mxu0 %vm65_vm0, %v21_v9  ;;  %v225_v18 = vld [vmem:[%s2977_s1 + $0x48] sm:$0xff] }
   0x7   :  { %1668 = vmatpush3.xpose.msk.msra.mxu0 %vm65_vm0, %v39_v2  ;;  %1735 = vmatprep.mubr.msk.f32.mxu1 %vm65_vm0, %v1549_v10  ;;  %v1553_v15 = vld [vmem:[%s2980_s4 + $0x20] sm:$0xff]  ;;  %v1554_v19 = vld [vmem:[%s2980_s4 + $0x28] sm:$0xff] }
   0x8   :  { %1706 = vmatpush3.xpose.msk.msra.mxu1 %vm65_vm0, %v230_v3  ;;  %1669 = vmatprep.subr.msk.mxu0 %vm65_vm0, %v38_v4  ;;  %v41_v16 = vld [vmem:[%s2980_s4] sm:$0xff]  ;;  %v42_v20 = vld [vmem:[%s2980_s4 + $0x8] sm:$0xff] }
   0x9   :  { %1707 = vmatprep.subr.msk.mxu1 %vm65_vm0, %v229_v5  ;;  %239 = vperm.xlu0 %1815, %v1553_v15   ;;  %v33_v21 = vld [vmem:[%s2976_s0 + $0x40] sm:$0xff] }
   0xa   :  { %47 = vperm.xlu1 %1816, %v41_v16   ;;  %v224_v22 = vld [vmem:[%s2977_s1 + $0x40] sm:$0xff] }
   0xb   :  { %1670 = vmatpush3.xpose.msk.msra.mxu0 %vm65_vm0, %v38_v4 }
   0xc   :  { %1708 = vmatpush3.xpose.msk.msra.mxu1 %vm65_vm0, %v229_v5  ;;  %1671 = vmatprep.subr.msk.mxu0 %vm65_vm0, %v37_v7 }
   0xd   :  { %1709 = vmatprep.subr.msk.mxu1 %vm65_vm0, %v228_v8  ;;  %244 = vperm.xlu0 %1815, %v1554_v19  }
   0xe   :  { %52 = vperm.xlu1 %1816, %v42_v20  }
   0xf   :  { %1672 = vmatpush3.xpose.msk.msra.mxu0 %vm65_vm0, %v37_v7 }
  0x10   :  { %1710 = vmatpush3.xpose.msk.msra.mxu1 %vm65_vm0, %v228_v8  ;;  %1673 = vmatprep.subr.msk.mxu0 %vm65_vm0, %v36_v11 }
  0x11   :  { %1711 = vmatprep.subr.msk.mxu1 %vm65_vm0, %v227_v12 }
  0x13   :  { %1674 = vmatpush3.xpose.msk.msra.mxu0 %vm65_vm0, %v36_v11 }
  0x14   :  { %1712 = vmatpush3.xpose.msk.msra.mxu1 %vm65_vm0, %v227_v12  ;;  %1675 = vmatprep.subr.msk.mxu0 %vm65_vm0, %v35_v13 }
  0x15   :  { %1713 = vmatprep.subr.msk.mxu1 %vm65_vm0, %v226_v14 }
  0x17   :  { %1676 = vmatpush3.xpose.msk.msra.mxu0 %vm65_vm0, %v35_v13 }
  0x18   :  { %1714 = vmatpush3.xpose.msk.msra.mxu1 %vm65_vm0, %v226_v14  ;;  %1677 = vmatprep.subr.msk.mxu0 %vm65_vm0, %v34_v17 }
  0x19   :  { %1715 = vmatprep.subr.msk.mxu1 %vm65_vm0, %v225_v18 }
  0x1a   :  { %10 = vsyncpa [#allocation3], 0  ;;  %v43_v23 = vld [vmem:[%s2980_s4 + $0x10] sm:$0xff]  ;;  %v44_v24 = vld [vmem:[%s2980_s4 + $0x18] sm:$0xff]  ;;  %v593_v10 = vlaneseq }
  0x1b   :  { %1678 = vmatpush3.xpose.msk.msra.mxu0 %vm65_vm0, %v34_v17  ;;  %v32_v25 = vld [vmem:[%s2976_s0 + $0x38] sm:$0xff]  ;;  %57 = vperm.xlu0 %1815, %v43_v23   ;;  %v1555_v27 = vld [vmem:[%s2980_s4 + $0x30] sm:$0xff]  ;;  %v1581_v31 = vld [vmem:[%s2980_s4 + $0x40] sm:$0xff] }
  0x1c   :  { %1716 = vmatpush3.xpose.msk.msra.mxu1 %vm65_vm0, %v225_v18  ;;  %1679 = vmatprep.subr.msk.mxu0 %vm65_vm0, %v33_v21  ;;  %v223_v26 = vld [vmem:[%s2977_s1 + $0x38] sm:$0xff]  ;;  %v31_v29 = vld [vmem:[%s2976_s0 + $0x30] sm:$0xff]  ;;  %v1582_v32 = vld [vmem:[%s2980_s4 + $0x48] sm:$0xff]  ;;  %v594_v13 = vshrl.u32 %v593_v10, 7 }
  0x1d   :  { %1717 = vmatprep.subr.msk.mxu1 %vm65_vm0, %v224_v22  ;;  %62 = vperm.xlu1 %1816, %v44_v24   ;;  %v1556_v28 = vld [vmem:[%s2980_s4 + $0x38] sm:$0xff]  ;;  %v222_v30 = vld [vmem:[%s2977_s1 + $0x30] sm:$0xff]  ;;  %v30_v33 = vld [vmem:[%s2976_s0 + $0x28] sm:$0xff] }
  0x1e   :  { %v221_v34 = vld [vmem:[%s2977_s1 + $0x28] sm:$0xff]  ;;  %v1583_v35 = vld [vmem:[%s2980_s4 + $0x50] sm:$0xff]  ;;  %v1584_v36 = vld [vmem:[%s2980_s4 + $0x58] sm:$0xff]  ;;  %v2269_v16 = vsub.s32 0, %v594_v13  ;;  %v2271_v17 = vsub.s32 1, %v594_v13  ;;  %v2273_v18 = vsub.s32 2, %v594_v13 }
  0x1f   :  { %1680 = vmatpush3.xpose.msk.msra.mxu0 %vm65_vm0, %v33_v21  ;;  %249 = vperm.xlu0 %1815, %v1555_v27   ;;  %v29_v37 = vld [vmem:[%s2976_s0 + $0x20] sm:$0xff]  ;;  %v28_v39 = vld [vmem:[%s2976_s0 + $0x18] sm:$0xff]  ;;  %v27_v41 = vld [vmem:[%s2976_s0 + $0x10] sm:$0xff]  ;;  %v2275_v19 = vsub.s32 3, %v594_v13  ;;  %v2279_v23 = vsub.s32 5, %v594_v13  ;;  %v2285_v27 = vsub.s32 7, %v594_v13 }
  0x20   :  { %1718 = vmatpush3.xpose.msk.msra.mxu1 %vm65_vm0, %v224_v22  ;;  %1681 = vmatprep.subr.msk.mxu0 %vm65_vm0, %v32_v25  ;;  %v220_v38 = vld [vmem:[%s2977_s1 + $0x20] sm:$0xff]  ;;  %v219_v40 = vld [vmem:[%s2977_s1 + $0x18] sm:$0xff]  ;;  %v218_v42 = vld [vmem:[%s2977_s1 + $0x10] sm:$0xff]  ;;  %3004 = vst [vmem:[#allocation5_spill] sm:$0xff] %v2269_v16  ;;  %v2277_v22 = vsub.s32 4, %v594_v13 }
  0x21   :  { %1719 = vmatprep.subr.msk.mxu1 %vm65_vm0, %v223_v26  ;;  %254 = vperm.xlu1 %1816, %v1556_v28   ;;  %v26_v43 = vld [vmem:[%s2976_s0 + $0x8] sm:$0xff]  ;;  %v25_v45 = vld [vmem:[%s2976_s0] sm:$0xff]  ;;  %v422_v47 = vld [vmem:[%s2978_s2 + $0x78] sm:$0xff] }
  0x22   :  { %v217_v44 = vld [vmem:[%s2977_s1 + $0x8] sm:$0xff]  ;;  %v216_v46 = vld [vmem:[%s2977_s1] sm:$0xff]  ;;  %v23_v50 = vld [vmem:[%s2979_s3 + $0x10] sm:$0xff] }
  0x23   :  { %1682 = vmatpush3.xpose.msk.msra.mxu0 %vm65_vm0, %v32_v25  ;;  %430 = vperm.xlu0 %1815, %v1581_v31   ;;  %v22_v48 = vld [vmem:[%s2979_s3 + $0x8] sm:$0xff]  ;;  %v1551_v51 = vld [vmem:[%s2979_s3 + $0x30] sm:$0xff]  ;;  %v24_v53 = vld [vmem:[%s2979_s3 + $0x18] sm:$0xff]  ;;  %v2281_v25 = vsub.s32 6, %v594_v13 }
  0x24   :  { %1720 = vmatpush3.xpose.msk.msra.mxu1 %vm65_vm0, %v223_v26  ;;  %1683 = vmatprep.subr.msk.mxu0 %vm65_vm0, %v31_v29  ;;  %v1550_v49 = vld [vmem:[%s2979_s3 + $0x28] sm:$0xff]  ;;  %v421_v52 = vld [vmem:[%s2978_s2 + $0x70] sm:$0xff]  ;;  %v1552_v54 = vld [vmem:[%s2979_s3 + $0x38] sm:$0xff] }
  0x25   :  { %1721 = vmatprep.subr.msk.mxu1 %vm65_vm0, %v222_v30  ;;  %435 = vperm.xlu1 %1816, %v1582_v32   ;;  %v420_v55 = vld [vmem:[%s2978_s2 + $0x68] sm:$0xff]  ;;  %v1579_v56 = vld [vmem:[%s2979_s3 + $0x50] sm:$0xff]  ;;  %v1577_v57 = vld [vmem:[%s2979_s3 + $0x40] sm:$0xff] }
  0x26   :  { %v419_v58 = vld [vmem:[%s2978_s2 + $0x60] sm:$0xff]  ;;  %v418_v59 = vld [vmem:[%s2978_s2 + $0x58] sm:$0xff]  ;;  %v417_v60 = vld [vmem:[%s2978_s2 + $0x50] sm:$0xff] }
  0x27   :  { %1684 = vmatpush3.xpose.msk.msra.mxu0 %vm65_vm0, %v31_v29  ;;  %440 = vperm.xlu0 %1815, %v1583_v35   ;;  %v416_v61 = vld [vmem:[%s2978_s2 + $0x48] sm:$0xff]  ;;  %v415_v62 = vld [vmem:[%s2978_s2 + $0x40] sm:$0xff]  ;;  %v414_v63 = vld [vmem:[%s2978_s2 + $0x38] sm:$0xff] }
  0x28   :  { %1722 = vmatpush3.xpose.msk.msra.mxu1 %vm65_vm0, %v222_v30  ;;  %1685 = vmatprep.subr.msk.mxu0 %vm65_vm0, %v30_v33  ;;  %v413_v0 = vld [vmem:[%s2978_s2 + $0x30] sm:$0xff]  ;;  %v412_v1 = vld [vmem:[%s2978_s2 + $0x28] sm:$0xff]  ;;  %v411_v2 = vld [vmem:[%s2978_s2 + $0x20] sm:$0xff] }
  0x29   :  { %1723 = vmatprep.subr.msk.mxu1 %vm65_vm0, %v221_v34  ;;  %445 = vperm.xlu1 %1816, %v1584_v36   ;;  %v410_v3 = vld [vmem:[%s2978_s2 + $0x18] sm:$0xff]  ;;  %v409_v4 = vld [vmem:[%s2978_s2 + $0x10] sm:$0xff]  ;;  %v408_v5 = vld [vmem:[%s2978_s2 + $0x8] sm:$0xff] }
  0x2a   :  { %v407_v6 = vld [vmem:[%s2978_s2] sm:$0xff]  ;;  %v1578_v7 = vld [vmem:[%s2979_s3 + $0x48] sm:$0xff]  ;;  %v1580_v8 = vld [vmem:[%s2979_s3 + $0x58] sm:$0xff]  ;;  %s1880_s2 = smov [#allocation2]  }
  0x2b   :  { %1686 = vmatpush3.xpose.msk.msra.mxu0 %vm65_vm0, %v30_v33  ;;  %s1518_s3 = sshll.u32 %s1880_s2, 4  ;;  %s1519_s3 = int_to_ptr.vmem [resolvable:$true] %s1518_s3 }
  0x2c   :  { %1724 = vmatpush3.xpose.msk.msra.mxu1 %vm65_vm0, %v221_v34  ;;  %1687 = vmatprep.subr.msk.mxu0 %vm65_vm0, %v29_v37  ;;  %s1857_s30 = scalar_lea.vmem %s1519_s3, 512  ;;  %p1862_p1 = scmp.lt.s32.totalorder %s1519_s3, %s1519_s3 }
  0x2d   :  { %1725 = vmatprep.subr.msk.mxu1 %vm65_vm0, %v220_v38  ;;  %p1858_p0 = scmp.ne.s32.totalorder %s1519_s3, %s1857_s30  ;;  %p1863_p2 = scmp.lt.s32.totalorder %s1857_s30, %s1857_s30 }
  0x2f   :  { %1688 = vmatpush3.xpose.msk.msra.mxu0 %vm65_vm0, %v29_v37  ;;  %p1864_p3 = por %p1863_p2, %p1862_p1 }
  0x30   :  { %1726 = vmatpush3.xpose.msk.msra.mxu1 %vm65_vm0, %v220_v38  ;;  %1689 = vmatprep.subr.msk.mxu0 %vm65_vm0, %v28_v39 }
  0x31   :  { %1727 = vmatprep.subr.msk.mxu1 %vm65_vm0, %v219_v40  ;;  %p1865_p4 = pnand %p1864_p3, %p1858_p0 }
  0x33   :  { %1690 = vmatpush3.xpose.msk.msra.mxu0 %vm65_vm0, %v28_v39 }
  0x34   :  { %1728 = vmatpush3.xpose.msk.msra.mxu1 %vm65_vm0, %v219_v40  ;;  %1691 = vmatprep.subr.msk.mxu0 %vm65_vm0, %v27_v41 }
  0x35   :  { %1729 = vmatprep.subr.msk.mxu1 %vm65_vm0, %v218_v42 }
  0x37   :  { %1692 = vmatpush3.xpose.msk.msra.mxu0 %vm65_vm0, %v27_v41 }
  0x38   :  { %1730 = vmatpush3.xpose.msk.msra.mxu1 %vm65_vm0, %v218_v42  ;;  %1693 = vmatprep.subr.msk.mxu0 %vm65_vm0, %v26_v43 }
  0x39   :  { %1731 = vmatprep.subr.msk.mxu1 %vm65_vm0, %v217_v44 }
  0x3b   :  { %1694 = vmatpush3.xpose.msk.msra.mxu0 %vm65_vm0, %v26_v43 }
  0x3c   :  { %1732 = vmatpush3.xpose.msk.msra.mxu1 %vm65_vm0, %v217_v44  ;;  %1695 = vmatprep.subr.msk.mxu0 %vm65_vm0, %v25_v45 }
  0x3d   :  { %1733 = vmatprep.subr.msk.mxu1 %vm65_vm0, %v216_v46 }
  0x3f   :  { %1696 = vmatpush3.xpose.msk.msra.mxu0 %vm65_vm0, %v25_v45 }
  0x40   :  { %1734 = vmatpush3.xpose.msk.msra.mxu1 %vm65_vm0, %v216_v46  ;;  %1741 = vmatprep.subr.msk.mxu0 %vm65_vm0, %v422_v47 }
  0x41   :  { %1779 = vmatprep.subr.msk.mxu1 %vm65_vm0, %v422_v47 }
  0x42   :  { %1698 = vmatmul.mubr.msk.f32.vlgmr.msra.gmra.mxu0 %vm65_vm0, %v22_v48 }
  0x43   :  { %1736 = vmatmul.mubr.msk.f32.vlgmr.msra.gmra.mxu1 %vm65_vm0, %v1550_v49  ;;  %1742 = vmatpush3.xpose.msk.msra.mxu0 %vm65_vm0, %v422_v47 }
  0x44   :  { %1795 = vmatpush3.xpose.msk.msra.mxu1 %vm65_vm0, %v422_v47  ;;  %1700 = vmatprep.mubr.msk.f32.mxu0 %vm65_vm0, %v23_v50 }
  0x45   :  { %1738 = vmatprep.mubr.msk.f32.mxu1 %vm65_vm0, %v1551_v51  ;;  %1743 = vmatprep.subr.msk.mxu0 %vm65_vm0, %v421_v52 }
  0x46   :  { %1780 = vmatprep.subr.msk.mxu1 %vm65_vm0, %v421_v52  ;;  %1701 = vmatmul.mubr.msk.f32.gmra.mxu0 %vm65_vm0, %v24_v53 }
  0x47   :  { %1739 = vmatmul.mubr.msk.f32.gmra.mxu1 %vm65_vm0, %v1552_v54  ;;  %1744 = vmatpush3.xpose.msk.msra.mxu0 %vm65_vm0, %v421_v52 }
  0x48   :  { %1796 = vmatpush3.xpose.msk.msra.mxu1 %vm65_vm0, %v421_v52  ;;  %1745 = vmatprep.subr.msk.mxu0 %vm65_vm0, %v420_v55 }
  0x49   :  { %1781 = vmatprep.subr.msk.mxu1 %vm65_vm0, %v420_v55  ;;  %1776 = vmatprep.mubr.msk.f32.mxu1 %vm65_vm0, %v1579_v56 }
  0x4a   :  { %1773 = vmatprep.mubr.msk.f32.mxu0 %vm65_vm0, %v1577_v57 }
  0x4b   :  { %1746 = vmatpush3.xpose.msk.msra.mxu0 %vm65_vm0, %v420_v55 }
  0x4c   :  { %1797 = vmatpush3.xpose.msk.msra.mxu1 %vm65_vm0, %v420_v55  ;;  %1747 = vmatprep.subr.msk.mxu0 %vm65_vm0, %v419_v58 }
  0x4d   :  { %1782 = vmatprep.subr.msk.mxu1 %vm65_vm0, %v419_v58 }
  0x4f   :  { %1748 = vmatpush3.xpose.msk.msra.mxu0 %vm65_vm0, %v419_v58 }
  0x50   :  { %1798 = vmatpush3.xpose.msk.msra.mxu1 %vm65_vm0, %v419_v58  ;;  %1749 = vmatprep.subr.msk.mxu0 %vm65_vm0, %v418_v59 }
  0x51   :  { %1783 = vmatprep.subr.msk.mxu1 %vm65_vm0, %v418_v59 }
  0x53   :  { %1750 = vmatpush3.xpose.msk.msra.mxu0 %vm65_vm0, %v418_v59 }
  0x54   :  { %1799 = vmatpush3.xpose.msk.msra.mxu1 %vm65_vm0, %v418_v59  ;;  %1751 = vmatprep.subr.msk.mxu0 %vm65_vm0, %v417_v60 }
  0x55   :  { %1784 = vmatprep.subr.msk.mxu1 %vm65_vm0, %v417_v60 }
  0x57   :  { %1752 = vmatpush3.xpose.msk.msra.mxu0 %vm65_vm0, %v417_v60 }
  0x58   :  { %1800 = vmatpush3.xpose.msk.msra.mxu1 %vm65_vm0, %v417_v60  ;;  %1753 = vmatprep.subr.msk.mxu0 %vm65_vm0, %v416_v61 }
  0x59   :  { %1785 = vmatprep.subr.msk.mxu1 %vm65_vm0, %v416_v61 }
  0x5b   :  { %1754 = vmatpush3.xpose.msk.msra.mxu0 %vm65_vm0, %v416_v61 }
  0x5c   :  { %1801 = vmatpush3.xpose.msk.msra.mxu1 %vm65_vm0, %v416_v61  ;;  %1755 = vmatprep.subr.msk.mxu0 %vm65_vm0, %v415_v62 }
  0x5d   :  { %1786 = vmatprep.subr.msk.mxu1 %vm65_vm0, %v415_v62 }
  0x5f   :  { %1756 = vmatpush3.xpose.msk.msra.mxu0 %vm65_vm0, %v415_v62 }
  0x60   :  { %1802 = vmatpush3.xpose.msk.msra.mxu1 %vm65_vm0, %v415_v62  ;;  %1757 = vmatprep.subr.msk.mxu0 %vm65_vm0, %v414_v63 }
  0x61   :  { %1787 = vmatprep.subr.msk.mxu1 %vm65_vm0, %v414_v63 }
  0x63   :  { %1758 = vmatpush3.xpose.msk.msra.mxu0 %vm65_vm0, %v414_v63 }
  0x64   :  { %1803 = vmatpush3.xpose.msk.msra.mxu1 %vm65_vm0, %v414_v63  ;;  %1759 = vmatprep.subr.msk.mxu0 %vm65_vm0, %v413_v0 }
  0x65   :  { %1788 = vmatprep.subr.msk.mxu1 %vm65_vm0, %v413_v0 }
  0x67   :  { %1760 = vmatpush3.xpose.msk.msra.mxu0 %vm65_vm0, %v413_v0 }
  0x68   :  { %1804 = vmatpush3.xpose.msk.msra.mxu1 %vm65_vm0, %v413_v0  ;;  %1761 = vmatprep.subr.msk.mxu0 %vm65_vm0, %v412_v1 }
  0x69   :  { %1789 = vmatprep.subr.msk.mxu1 %vm65_vm0, %v412_v1 }
  0x6b   :  { %1762 = vmatpush3.xpose.msk.msra.mxu0 %vm65_vm0, %v412_v1 }
  0x6c   :  { %1805 = vmatpush3.xpose.msk.msra.mxu1 %vm65_vm0, %v412_v1  ;;  %1763 = vmatprep.subr.msk.mxu0 %vm65_vm0, %v411_v2 }
  0x6d   :  { %1790 = vmatprep.subr.msk.mxu1 %vm65_vm0, %v411_v2 }
  0x6f   :  { %1764 = vmatpush3.xpose.msk.msra.mxu0 %vm65_vm0, %v411_v2 }
  0x70   :  { %1806 = vmatpush3.xpose.msk.msra.mxu1 %vm65_vm0, %v411_v2  ;;  %1765 = vmatprep.subr.msk.mxu0 %vm65_vm0, %v410_v3 }
  0x71   :  { %1791 = vmatprep.subr.msk.mxu1 %vm65_vm0, %v410_v3 }
  0x73   :  { %1766 = vmatpush3.xpose.msk.msra.mxu0 %vm65_vm0, %v410_v3 }
  0x74   :  { %1807 = vmatpush3.xpose.msk.msra.mxu1 %vm65_vm0, %v410_v3  ;;  %1767 = vmatprep.subr.msk.mxu0 %vm65_vm0, %v409_v4 }
  0x75   :  { %1792 = vmatprep.subr.msk.mxu1 %vm65_vm0, %v409_v4 }
  0x77   :  { %1768 = vmatpush3.xpose.msk.msra.mxu0 %vm65_vm0, %v409_v4 }
  0x78   :  { %1808 = vmatpush3.xpose.msk.msra.mxu1 %vm65_vm0, %v409_v4  ;;  %1769 = vmatprep.subr.msk.mxu0 %vm65_vm0, %v408_v5 }
  0x79   :  { %1793 = vmatprep.subr.msk.mxu1 %vm65_vm0, %v408_v5 }
  0x7b   :  { %1770 = vmatpush3.xpose.msk.msra.mxu0 %vm65_vm0, %v408_v5 }
  0x7c   :  { %1809 = vmatpush3.xpose.msk.msra.mxu1 %vm65_vm0, %v408_v5  ;;  %1771 = vmatprep.subr.msk.mxu0 %vm65_vm0, %v407_v6 }
  0x7d   :  { %1794 = vmatprep.subr.msk.mxu1 %vm65_vm0, %v407_v6 }
  0x7f   :  { %1772 = vmatpush3.xpose.msk.msra.mxu0 %vm65_vm0, %v407_v6 }
  0x80   :  { %1810 = vmatpush3.xpose.msk.msra.mxu1 %vm65_vm0, %v407_v6 }
  0x82   :  { %1774 = vmatmul.mubr.msk.f32.vlgmr.msra.gmra.mxu0 %vm65_vm0, %v1578_v7 }
  0x83   :  { %1777 = vmatmul.mubr.msk.f32.vlgmr.msra.gmra.mxu1 %vm65_vm0, %v1580_v8 }
  0x84   :  { %v240_v11 = vpop.permute.xlu0 %239 }
  0x85   :  { %v48_v9 = vpop.permute.xlu1 %47 }
  0x88   :  { %v245_v14 = vpop.permute.xlu0 %244 }
  0x89   :  { %v53_v12 = vpop.permute.xlu1 %52 }
  0x98   :  { %v63_v15 = vpop.permute.xlu1 %62 }
  0x9c   :  { %v255_v42 = vpop.permute.xlu1 %254 }
 0x102   :  { %v1699_v20 = vpop.f32.mrf.mxu0 }
 0x103   :  { %v1737_v21 = vpop.f32.mrf.mxu1  ;;  %v2283_v26 = vadd.f32 %v1699_v20, %v53_v12 }
 0x104   :  { %v389_v24 = vadd.f32 %v1737_v21, %v245_v14  ;;  %v192_v28 = vpop.f32.mrf.mxu0 }
 0x105   :  { %v383_v29 = vpop.f32.mrf.mxu1  ;;  %v2316_v41 = vadd.f32 %v192_v28, %v48_v9 }
 0x106   :  { %v2288_v30 = vrot.slane %v389_v24, %v2269_v16  ;;  %v2291_v31 = vrot.slane %v389_v24, %v2271_v17  ;;  %v2294_v32 = vrot.slane %v389_v24, %v2273_v18  ;;  %v2297_v33 = vrot.slane %v389_v24, %v2275_v19  ;;  %v1702_v36 = vpop.f32.mrf.mxu0 }
 0x107   :  { %v2300_v34 = vrot.slane %v389_v24, %v2277_v22  ;;  %v2303_v35 = vrot.slane %v389_v24, %v2279_v23  ;;  %v1740_v37 = vpop.f32.mrf.mxu1  ;;  %v2314_v40 = vrot.slane %v389_v24, %v2281_v25  ;;  %v2323_v44 = vrot.slane %v389_v24, %v2285_v27 }
 0x108   :  { %3005 = vst [vmem:[#allocation6_spill] sm:$0xff] %v2297_v33  ;;  %v2307_v38 = vmul.f32 %v2291_v31, %v2283_v26  ;;  %v2311_v39 = vmul.f32 %v2294_v32, %v2283_v26  ;;  %v2320_v43 = vmul.f32 %v2288_v30, %v2283_v26  ;;  %v384_v45 = vadd.f32 %v383_v29, %v240_v11 }
 0x109   :  { %3006 = vst [vmem:[#allocation7_spill] sm:$0xff] %v2300_v34  ;;  %3007 = vst [vmem:[#allocation8_spill] sm:$0xff] %v2303_v35  ;;  %v2325_v46 = vadd.f32 %v1702_v36, %v63_v15  ;;  %v2329_v49 = vadd.f32 %v1740_v37, %v255_v42  ;;  %v2333_v50 = vmul.f32 %v2297_v33, %v2283_v26 }
 0x10a   :  { %3008 = vst [vmem:[#allocation9_spill] sm:$0xff] %v2307_v38  ;;  %3009 = vst [vmem:[#allocation10_spill] sm:$0xff] %v2311_v39  ;;  %v2337_v51 = vmul.f32 %v2288_v30, %v2316_v41  ;;  %v2340_v52 = vrot.slane %v384_v45, %v2269_v16  ;;  %v2343_v53 = vrot.slane %v384_v45, %v2271_v17 }
 0x10b   :  { %3010 = vst [vmem:[#allocation11_spill] sm:$0xff] %v2314_v40  ;;  %3011 = vst [vmem:[#allocation12_spill] sm:$0xff] %v2320_v43  ;;  %v2346_v54 = vrot.slane %v384_v45, %v2273_v18  ;;  %v2350_v55 = vmul.f32 %v2291_v31, %v2316_v41  ;;  %v2354_v56 = vmul.f32 %v2294_v32, %v2316_v41 }
 0x10c   :  { %3012 = vst [vmem:[#allocation13_spill] sm:$0xff] %v2323_v44  ;;  %3013 = vst [vmem:[#allocation14_spill] sm:$0xff] %v2333_v50  ;;  %v2357_v57 = vrot.slane %v384_v45, %v2275_v19  ;;  %v2360_v58 = vrot.slane %v384_v45, %v2277_v22  ;;  %v597_v59 = vmul.f32 %v2340_v52, %v2316_v41 }
 0x10d   :  { %3014 = vst [vmem:[#allocation15_spill] sm:$0xff] %v2337_v51  ;;  %3015 = vst [vmem:[#allocation16_spill] sm:$0xff] %v2350_v55  ;;  %v598_v60 = vmul.f32 %v2340_v52, %v2283_v26  ;;  %v605_v61 = vmul.f32 %v2343_v53, %v2316_v41  ;;  %v606_v62 = vmul.f32 %v2343_v53, %v2283_v26 }
 0x10e   :  { %3016 = vst [vmem:[#allocation17_spill] sm:$0xff] %v2354_v56  ;;  %v629_v63 = vmul.f32 %v2346_v54, %v2316_v41  ;;  %v630_v0 = vmul.f32 %v2346_v54, %v2283_v26  ;;  %v2376_v1 = vmul.f32 %v2357_v57, %v2316_v41  ;;  %v2380_v2 = vmul.f32 %v2357_v57, %v2283_v26 }
 0x10f   :  { %v613_v3 = vrot.slane %v605_v61, 1  ;;  %v614_v4 = vrot.slane %v606_v62, 1  ;;  %v2384_v5 = vmul.f32 %v2360_v58, %v2316_v41  ;;  %v2388_v6 = vmul.f32 %v2360_v58, %v2283_v26 }
 0x110   :  { %v637_v7 = vrot.slane %v629_v63, 2  ;;  %v638_v8 = vrot.slane %v630_v0, 2  ;;  %v2391_v9 = vrot.slane %v384_v45, %v2279_v23  ;;  %v2394_v10 = vrot.slane %v384_v45, %v2281_v25 }
 0x111   :  { %3017 = vst [vmem:[#allocation18_spill] sm:$0xff] %v2388_v6  ;;  %v621_v11 = vadd.f32 %v613_v3, %v597_v59  ;;  %v622_v12 = vadd.f32 %v614_v4, %v598_v60  ;;  %v2401_v21 = vrot.slane %v384_v45, %v2285_v27  ;;  %v2411_v37 = vmul.f32 %v2340_v52, %v2325_v46 }
 0x112   :  { %3018 = vst [vmem:[#allocation19_spill] sm:$0xff] %v2394_v10  ;;  %v2415_v42 = vmul.f32 %v2343_v53, %v2325_v46  ;;  %v2419_v45 = vmul.f32 %v2346_v54, %v2325_v46  ;;  %v2423_v59 = vmul.f32 %v2357_v57, %v2325_v46  ;;  %v2427_v60 = vmul.f32 %v2360_v58, %v2325_v46 }
 0x113   :  { %3019 = vst [vmem:[#allocation20_spill] sm:$0xff] %v2401_v21  ;;  %v2404_v28 = vadd.f32 %v637_v7, %v621_v11  ;;  %v2406_v29 = vadd.f32 %v638_v8, %v622_v12  ;;  %v2431_v61 = vmul.f32 %v2288_v30, %v2325_v46  ;;  %v2435_v62 = vrot.slane %v2329_v49, %v2269_v16 }
 0x114   :  { %v2439_v63 = vrot.slane %v2329_v49, %v2271_v17  ;;  %v2443_v0 = vrot.slane %v2329_v49, %v2273_v18  ;;  %v2447_v3 = vmul.f32 %v2291_v31, %v2325_v46  ;;  %v2451_v4 = vrot.slane %v2329_v49, %v2275_v19 }
 0x115   :  { %3020 = vst [vmem:[#allocation21_spill] sm:$0xff] %v2431_v61  ;;  %v2455_v7 = vrot.slane %v2329_v49, %v2277_v22  ;;  %v2459_v8 = vrot.slane %v2329_v49, %v2279_v23  ;;  %v1137_v11 = vmul.f32 %v2435_v62, %v2316_v41  ;;  %v1138_v12 = vmul.f32 %v2435_v62, %v2283_v26 }
 0x116   :  { %v1145_v48 = vmul.f32 %v2439_v63, %v2316_v41  ;;  %v2469_v36 = vrot.slane %v2329_v49, %v2281_v25  ;;  %v1146_v47 = vmul.f32 %v2439_v63, %v2283_v26  ;;  %v1148_v24 = vmul.f32 %v2439_v63, %v2325_v46 }
 0x117   :  { %v1169_v20 = vmul.f32 %v2443_v0, %v2316_v41  ;;  %v1170_v15 = vmul.f32 %v2443_v0, %v2283_v26  ;;  %v1172_v13 = vmul.f32 %v2443_v0, %v2325_v46  ;;  %v1193_v44 = vmul.f32 %v2451_v4, %v2316_v41 }
 0x118   :  { %v1153_v14 = vrot.slane %v1145_v48, 1  ;;  %v1194_v40 = vmul.f32 %v2451_v4, %v2283_v26  ;;  %v1140_v35 = vmul.f32 %v2435_v62, %v2325_v46  ;;  %v1154_v34 = vrot.slane %v1146_v47, 1 }
 0x119   :  { %v1156_v50 = vrot.slane %v1148_v24, 1  ;;  %v1177_v33 = vrot.slane %v1169_v20, 2  ;;  %v1178_v56 = vrot.slane %v1170_v15, 2  ;;  %v1180_v61 = vrot.slane %v1172_v13, 2 }
 0x11a   :  { %v1161_v39 = vadd.f32 %v1153_v14, %v1137_v11  ;;  %v1196_v48 = vmul.f32 %v2451_v4, %v2325_v46  ;;  %v1162_v38 = vadd.f32 %v1154_v34, %v1138_v12  ;;  %v1201_v55 = vrot.slane %v1193_v44, 3  ;;  %v58_v34 = vpop.permute.xlu0 %57  ;;  %v202_v11 = vpop.f32.mrf.mxu0 }
 0x11b   :  { %v1164_v43 = vadd.f32 %v1156_v50, %v1140_v35  ;;  %v1217_v51 = vmul.f32 %v2455_v7, %v2316_v41  ;;  %v1202_v10 = vrot.slane %v1194_v40, 3  ;;  %v1218_v6 = vmul.f32 %v2455_v7, %v2283_v26 }
 0x11c   :  { %v1185_v21 = vadd.f32 %v1177_v33, %v1161_v39  ;;  %v1220_v47 = vmul.f32 %v2455_v7, %v2325_v46  ;;  %v1186_v14 = vadd.f32 %v1178_v56, %v1162_v38  ;;  %v1204_v13 = vrot.slane %v1196_v48, 3 }
 0x11d   :  { %v1188_v15 = vadd.f32 %v1180_v61, %v1164_v43  ;;  %v2497_v20 = vmul.f32 %v2459_v8, %v2316_v41  ;;  %v2501_v35 = vmul.f32 %v2294_v32, %v2325_v46  ;;  %v1225_v39 = vrot.slane %v1217_v51, 4 }
 0x11e   :  { %v1209_v33 = vadd.f32 %v1201_v55, %v1185_v21  ;;  %v2505_v40 = vmul.f32 %v2459_v8, %v2283_v26  ;;  %v1210_v44 = vadd.f32 %v1202_v10, %v1186_v14  ;;  %v1226_v38 = vrot.slane %v1218_v6, 4 }
 0x11f   :  { %3021 = vst [vmem:[#allocation22_spill] sm:$0xff] %v2497_v20  ;;  %v1212_v50 = vadd.f32 %v1204_v13, %v1188_v15  ;;  %v2509_v43 = vmul.f32 %v2459_v8, %v2325_v46  ;;  %v1228_v56 = vrot.slane %v1220_v47, 4  ;;  %v2514_v61 = vmul.f32 %v2469_v36, %v2316_v41  ;;  %v393_v15 = vpop.f32.mrf.mxu1 }
 0x120   :  { %3022 = vst [vmem:[#allocation23_spill] sm:$0xff] %v2505_v40  ;;  %v2518_v51 = vmul.f32 %v2469_v36, %v2283_v26  ;;  %v2520_v55 = vadd.f32 %v1225_v39, %v1209_v33  ;;  %v2522_v10 = vadd.f32 %v1226_v38, %v1210_v44  ;;  %v2527_v21 = vmul.f32 %v2469_v36, %v2325_v46  ;;  %v250_v38 = vpop.permute.xlu0 %249 }
 0x121   :  { %3023 = vst [vmem:[#allocation24_spill] sm:$0xff] %v2509_v43  ;;  %3024 = vst [vmem:[#allocation25_spill] sm:$0xff] %v2514_v61  ;;  %v2529_v12 = vadd.f32 %v1228_v56, %v1212_v50  ;;  %v616_v14 = vrot.slane %v2415_v42, 1  ;;  %v2538_v39 = vrot.slane %v2329_v49, %v2285_v27  ;;  %v2544_v48 = vadd.f32 %v202_v11, %v58_v34 }
 0x122   :  { %3025 = vst [vmem:[#allocation26_spill] sm:$0xff] %v2518_v51  ;;  %3026 = vst [vmem:[#allocation27_spill] sm:$0xff] %v2520_v55  ;;  %v2550_v33 = vadd.f32 %v393_v15, %v250_v38  ;;  %v3031_v49 = vrot.slane %v2376_v1, 3  ;;  %v3032_v11 = vrot.slane %v2380_v2, 3 }
 0x123   :  { %3027 = vst [vmem:[#allocation28_spill] sm:$0xff] %v2522_v10  ;;  %3028 = vst [vmem:[#allocation29_spill] sm:$0xff] %v2527_v21  ;;  %v2548_v13 = vadd.f32 %v616_v14, %v2411_v37  ;;  %v2559_v24 = vmul.f32 %v2340_v52, %v2544_v48  ;;  %v2563_v34 = vmul.f32 %v2343_v53, %v2544_v48 }
 0x124   :  { %3029 = vst [vmem:[#allocation30_spill] sm:$0xff] %v2529_v12  ;;  %3030 = vst [vmem:[#allocation31_spill] sm:$0xff] %v2538_v39  ;;  %v2555_v6 = vadd.f32 %v3031_v49, %v2404_v28  ;;  %v2568_v37 = vadd.f32 %v3032_v11, %v2406_v29  ;;  %v2572_v14 = vmul.f32 %v2391_v9, %v2316_v41 }
 0x125   :  { %v2576_v1 = vmul.f32 %v2346_v54, %v2544_v48  ;;  %v2580_v52 = vmul.f32 %v2357_v57, %v2544_v48  ;;  %v2584_v53 = vmul.f32 %v2360_v58, %v2544_v48  ;;  %v2588_v2 = vmul.f32 %v2288_v30, %v2544_v48 }
 0x126   :  { %v2592_v28 = vmul.f32 %v2291_v31, %v2544_v48  ;;  %v2596_v54 = vmul.f32 %v2294_v32, %v2544_v48  ;;  %v2600_v57 = vmul.f32 %v2435_v62, %v2544_v48  ;;  %v2604_v58 = vmul.f32 %v2439_v63, %v2544_v48 }
 0x127   :  { %v2608_v30 = vmul.f32 %v2443_v0, %v2544_v48  ;;  %v2612_v31 = vmul.f32 %v2451_v4, %v2544_v48  ;;  %v2616_v32 = vmul.f32 %v2455_v7, %v2544_v48  ;;  %v956_v29 = vrot.slane %v2550_v33, %v2269_v16 }
 0x128   :  { %v964_v62 = vrot.slane %v2550_v33, %v2271_v17  ;;  %v988_v63 = vrot.slane %v2550_v33, %v2273_v18  ;;  %v1012_v0 = vrot.slane %v2550_v33, %v2275_v19  ;;  %v1036_v4 = vrot.slane %v2550_v33, %v2277_v22 }
 0x129   :  { %v957_v15 = vmul.f32 %v956_v29, %v2316_v41  ;;  %v958_v7 = vmul.f32 %v956_v29, %v2283_v26  ;;  %v959_v38 = vmul.f32 %v956_v29, %v2544_v48  ;;  %v960_v49 = vmul.f32 %v956_v29, %v2325_v46 }
 0x12a   :  { %v965_v11 = vmul.f32 %v964_v62, %v2316_v41  ;;  %v966_v17 = vmul.f32 %v964_v62, %v2283_v26  ;;  %v967_v18 = vmul.f32 %v964_v62, %v2544_v48  ;;  %v968_v42 = vmul.f32 %v964_v62, %v2325_v46 }
 0x12b   :  { %v989_v19 = vmul.f32 %v988_v63, %v2316_v41  ;;  %v990_v22 = vmul.f32 %v988_v63, %v2283_v26  ;;  %v991_v47 = vmul.f32 %v988_v63, %v2544_v48  ;;  %v992_v56 = vmul.f32 %v988_v63, %v2325_v46 }
 0x12c   :  { %v973_v50 = vrot.slane %v965_v11, 1  ;;  %v974_v44 = vrot.slane %v966_v17, 1  ;;  %v975_v16 = vrot.slane %v967_v18, 1  ;;  %v976_v29 = vrot.slane %v968_v42, 1 }
 0x12d   :  { %v997_v39 = vrot.slane %v989_v19, 2  ;;  %v998_v21 = vrot.slane %v990_v22, 2  ;;  %v999_v51 = vrot.slane %v991_v47, 2  ;;  %v1000_v61 = vrot.slane %v992_v56, 2 }
 0x12e   :  { %v981_v43 = vadd.f32 %v973_v50, %v957_v15  ;;  %v982_v12 = vadd.f32 %v974_v44, %v958_v7  ;;  %v983_v40 = vadd.f32 %v975_v16, %v959_v38  ;;  %v984_v62 = vadd.f32 %v976_v29, %v960_v49 }
 0x12f   :  { %v1013_v10 = vmul.f32 %v1012_v0, %v2316_v41  ;;  %v1014_v20 = vmul.f32 %v1012_v0, %v2283_v26  ;;  %v1015_v55 = vmul.f32 %v1012_v0, %v2544_v48  ;;  %v1016_v63 = vmul.f32 %v1012_v0, %v2325_v46 }
 0x130   :  { %v1005_v11 = vadd.f32 %v997_v39, %v981_v43  ;;  %v1006_v17 = vadd.f32 %v998_v21, %v982_v12  ;;  %v1007_v18 = vadd.f32 %v999_v51, %v983_v40  ;;  %v1008_v42 = vadd.f32 %v1000_v61, %v984_v62 }
 0x131   :  { %v1021_v19 = vrot.slane %v1013_v10, 3  ;;  %v1022_v22 = vrot.slane %v1014_v20, 3  ;;  %v1023_v47 = vrot.slane %v1015_v55, 3  ;;  %v1024_v56 = vrot.slane %v1016_v63, 3 }
 0x132   :  { %v2645_v44 = vmul.f32 %v1036_v4, %v2316_v41  ;;  %v2648_v16 = vmul.f32 %v1036_v4, %v2283_v26  ;;  %v2651_v50 = vmul.f32 %v1036_v4, %v2544_v48  ;;  %v2654_v15 = vmul.f32 %v1036_v4, %v2325_v46 }
 0x133   :  { %v2658_v40 = vmul.f32 %v2459_v8, %v2544_v48  ;;  %v2662_v20 = vmul.f32 %v2469_v36, %v2544_v48  ;;  %v2664_v43 = vadd.f32 %v1021_v19, %v1005_v11  ;;  %v2666_v61 = vadd.f32 %v1022_v22, %v1006_v17 }
 0x134   :  { %v2668_v51 = vadd.f32 %v1023_v47, %v1007_v18  ;;  %v2670_v55 = vadd.f32 %v1024_v56, %v1008_v42  ;;  %v1045_v10 = vrot.slane %v2645_v44, 4  ;;  %v1046_v21 = vrot.slane %v2648_v16, 4  ;;  %v3036_v47 = vld [vmem:[#allocation18_spill] sm:$0xff] }
 0x135   :  { %v1047_v12 = vrot.slane %v2651_v50, 4  ;;  %v1048_v8 = vrot.slane %v2654_v15, 4  ;;  %v1060_v36 = vrot.slane %v2550_v33, %v2279_v23  ;;  %v2680_v39 = vrot.slane %v2550_v33, %v2281_v25 }
 0x136   :  { %v2684_v0 = vrot.slane %v2550_v33, %v2285_v27  ;;  %v615_v4 = vrot.slane %v2563_v34, 1  ;;  %v639_v7 = vrot.slane %v2576_v1, 2  ;;  %v3033_v38 = vrot.slane %v2419_v45, 2 }
 0x137   :  { %v2692_v29 = vmul.f32 %v1060_v36, %v2316_v41  ;;  %v2695_v23 = vmul.f32 %v1060_v36, %v2283_v26  ;;  %v2698_v25 = vmul.f32 %v1060_v36, %v2544_v48  ;;  %v2701_v27 = vmul.f32 %v1060_v36, %v2325_v46 }
 0x138   :  { %v648_v49 = vadd.f32 %v3033_v38, %v2548_v13  ;;  %v663_v33 = vrot.slane %v2580_v52, 3  ;;  %v687_v34 = vrot.slane %v2584_v53, 4  ;;  %v795_v1 = vrot.slane %v2592_v28, 1 }
 0x139   :  { %v819_v45 = vrot.slane %v2596_v54, 2  ;;  %v1069_v13 = vrot.slane %v2692_v29, 5  ;;  %v1070_v62 = vrot.slane %v2695_v23, 5  ;;  %v623_v28 = vadd.f32 %v615_v4, %v2559_v24 }
 0x13a   :  { %v3034_v54 = vrot.slane %v2423_v59, 3  ;;  %v3035_v19 = vrot.slane %v2384_v5, 4  ;;  %v3037_v56 = vrot.slane %v3036_v47, 4  ;;  %v702_v38 = vmul.f32 %v2391_v9, %v2283_v26 }
 0x13b   :  { %v703_v52 = vmul.f32 %v2391_v9, %v2544_v48  ;;  %v704_v24 = vmul.f32 %v2391_v9, %v2325_v46  ;;  %v709_v59 = vrot.slane %v2572_v14, 5  ;;  %v647_v4 = vadd.f32 %v639_v7, %v623_v28 }
 0x13c   :  { %v672_v42 = vadd.f32 %v3034_v54, %v648_v49  ;;  %v693_v22 = vadd.f32 %v3035_v19, %v2555_v6  ;;  %v694_v36 = vadd.f32 %v3037_v56, %v2568_v37  ;;  %v3038_v49 = vrot.slane %v2427_v60, 4  ;;  %v3039_v6 = vld [vmem:[#allocation19_spill] sm:$0xff] }
 0x13d   :  { %v725_v54 = vmul.f32 %v3039_v6, %v2316_v41  ;;  %v726_v37 = vmul.f32 %v3039_v6, %v2283_v26  ;;  %v710_v47 = vrot.slane %v702_v38, 5  ;;  %v712_v56 = vrot.slane %v704_v24, 5 }
 0x13e   :  { %v696_v5 = vadd.f32 %v3038_v49, %v672_v42  ;;  %v717_v53 = vadd.f32 %v709_v59, %v693_v22  ;;  %v671_v11 = vadd.f32 %v663_v33, %v647_v4  ;;  %v727_v9 = vmul.f32 %v3039_v6, %v2544_v48  ;;  %v3040_v49 = vld [vmem:[#allocation20_spill] sm:$0xff] }
 0x13f   :  { %v728_v14 = vmul.f32 %v3039_v6, %v2325_v46  ;;  %v733_v60 = vrot.slane %v725_v54, 6  ;;  %v718_v7 = vadd.f32 %v710_v47, %v694_v36  ;;  %v734_v42 = vrot.slane %v726_v37, 6 }
 0x140   :  { %v720_v28 = vadd.f32 %v712_v56, %v696_v5  ;;  %v749_v63 = vmul.f32 %v3040_v49, %v2316_v41  ;;  %v695_v18 = vadd.f32 %v687_v34, %v671_v11  ;;  %v711_v17 = vrot.slane %v703_v52, 5  ;;  %v3041_v34 = vld [vmem:[#allocation15_spill] sm:$0xff]  ;;  %v3042_v11 = vld [vmem:[#allocation16_spill] sm:$0xff]  ;;  %v3045_v56 = vld [vmem:[#allocation9_spill] sm:$0xff] }
 0x141   :  { %v735_v19 = vrot.slane %v727_v9, 6  ;;  %v736_v38 = vrot.slane %v728_v14, 6  ;;  %v741_v24 = vadd.f32 %v733_v60, %v717_v53  ;;  %v742_v22 = vadd.f32 %v734_v42, %v718_v7  ;;  %v3044_v53 = vld [vmem:[#allocation12_spill] sm:$0xff] }
 0x142   :  { %v750_v33 = vmul.f32 %v3040_v49, %v2283_v26  ;;  %v751_v59 = vmul.f32 %v3040_v49, %v2544_v48  ;;  %v719_v4 = vadd.f32 %v711_v17, %v695_v18  ;;  %v752_v36 = vmul.f32 %v3040_v49, %v2325_v46  ;;  %v3047_v49 = vld [vmem:[#allocation21_spill] sm:$0xff] }
 0x143   :  { %v744_v6 = vadd.f32 %v736_v38, %v720_v28  ;;  %v757_v5 = vrot.slane %v749_v63, 7  ;;  %v3043_v52 = vrot.slane %v3042_v11, 1  ;;  %v3046_v9 = vrot.slane %v3045_v56, 1 }
 0x144   :  { %v758_v54 = vrot.slane %v750_v33, 7  ;;  %v759_v37 = vrot.slane %v751_v59, 7  ;;  %v743_v60 = vadd.f32 %v735_v19, %v719_v4  ;;  %v760_v7 = vrot.slane %v752_v36, 7  ;;  %v3049_v33 = vld [vmem:[#allocation17_spill] sm:$0xff]  ;;  %v3051_v19 = vld [vmem:[#allocation10_spill] sm:$0xff] }
 0x145   :  { %v801_v47 = vadd.f32 %v3043_v52, %v3041_v34  ;;  %v802_v14 = vadd.f32 %v3046_v9, %v3044_v53  ;;  %v765_v42 = vadd.f32 %v757_v5, %v741_v24  ;;  %v803_v17 = vadd.f32 %v795_v1, %v2588_v2  ;;  %v3053_v1 = vld [vmem:[#allocation6_spill] sm:$0xff] }
 0x146   :  { %v1275_v18 = vrot.slane %v2662_v20, 6  ;;  %v766_v28 = vadd.f32 %v758_v54, %v742_v22  ;;  %v3048_v63 = vrot.slane %v2447_v3, 1  ;;  %v3050_v59 = vrot.slane %v3049_v33, 2 }
 0x147   :  { %v767_v34 = vadd.f32 %v759_v37, %v743_v60  ;;  %v2763_v52 = vadd.f32 %v760_v7, %v744_v6  ;;  %v2765_v56 = vmul.f32 0.35355338, %v765_v42  ;;  %v3052_v4 = vrot.slane %v3051_v19, 2 }
 0x148   :  { %v804_v38 = vadd.f32 %v3048_v63, %v3047_v49  ;;  %v825_v11 = vadd.f32 %v3050_v59, %v801_v47  ;;  %v2769_v36 = vmul.f32 0.35355338, %v766_v28  ;;  %v827_v2 = vadd.f32 %v819_v45, %v803_v17  ;;  %v3055_v47 = vld [vmem:[#allocation14_spill] sm:$0xff]  ;;  %v3056_v45 = vld [vmem:[#allocation7_spill] sm:$0xff] }
 0x149   :  { %v826_v24 = vadd.f32 %v3052_v4, %v802_v14  ;;  %v833_v22 = vmul.f32 %v3053_v1, %v2316_v41  ;;  %v835_v3 = vmul.f32 %v3053_v1, %v2544_v48  ;;  %v2775_v5 = vmul.f32 0.35355338, %v767_v34  ;;  %v3057_v4 = vld [vmem:[#allocation8_spill] sm:$0xff] }
 0x14a   :  { %v3054_v54 = vrot.slane %v2501_v35, 2  ;;  %v836_v37 = vmul.f32 %v3053_v1, %v2325_v46  ;;  %v842_v53 = vrot.slane %v3055_v47, 3  ;;  %v857_v60 = vmul.f32 %v3056_v45, %v2316_v41 }
 0x14b   :  { %v841_v9 = vrot.slane %v833_v22, 3  ;;  %v843_v14 = vrot.slane %v835_v3, 3  ;;  %v858_v7 = vmul.f32 %v3056_v45, %v2283_v26  ;;  %v859_v28 = vmul.f32 %v3056_v45, %v2544_v48 }
 0x14c   :  { %v828_v6 = vadd.f32 %v3054_v54, %v804_v38  ;;  %v844_v42 = vrot.slane %v836_v37, 3  ;;  %v850_v17 = vadd.f32 %v842_v53, %v826_v24  ;;  %v860_v35 = vmul.f32 %v3056_v45, %v2325_v46 }
 0x14d   :  { %v849_v49 = vadd.f32 %v841_v9, %v825_v11  ;;  %v851_v63 = vadd.f32 %v843_v14, %v827_v2  ;;  %v865_v38 = vrot.slane %v857_v60, 4  ;;  %v866_v33 = vrot.slane %v858_v7, 4  ;;  %v3058_v9 = vld [vmem:[#allocation11_spill] sm:$0xff] }
 0x14e   :  { %v852_v59 = vadd.f32 %v844_v42, %v828_v6  ;;  %v867_v34 = vrot.slane %v859_v28, 4  ;;  %v868_v19 = vrot.slane %v860_v35, 4  ;;  %v881_v1 = vmul.f32 %v3057_v4, %v2316_v41 }
 0x14f   :  { %v873_v22 = vadd.f32 %v865_v38, %v849_v49  ;;  %v874_v3 = vadd.f32 %v866_v33, %v850_v17  ;;  %v882_v24 = vmul.f32 %v3057_v4, %v2283_v26  ;;  %v883_v54 = vmul.f32 %v3057_v4, %v2544_v48 }
 0x150   :  { %v875_v37 = vadd.f32 %v867_v34, %v851_v63  ;;  %v876_v47 = vadd.f32 %v868_v19, %v852_v59  ;;  %v884_v11 = vmul.f32 %v3057_v4, %v2325_v46  ;;  %v889_v2 = vrot.slane %v881_v1, 5  ;;  %v3059_v34 = vld [vmem:[#allocation13_spill] sm:$0xff] }
 0x151   :  { %v890_v6 = vrot.slane %v882_v24, 5  ;;  %v891_v53 = vrot.slane %v883_v54, 5  ;;  %v905_v14 = vmul.f32 %v3058_v9, %v2316_v41  ;;  %v906_v45 = vmul.f32 %v3058_v9, %v2283_v26 }
 0x152   :  { %v892_v60 = vrot.slane %v884_v11, 5  ;;  %v897_v7 = vadd.f32 %v889_v2, %v873_v22  ;;  %v907_v42 = vmul.f32 %v3058_v9, %v2544_v48  ;;  %v908_v17 = vmul.f32 %v3058_v9, %v2325_v46 }
 0x153   :  { %v898_v28 = vadd.f32 %v890_v6, %v874_v3  ;;  %v899_v35 = vadd.f32 %v891_v53, %v875_v37  ;;  %v913_v49 = vrot.slane %v905_v14, 6  ;;  %v914_v63 = vrot.slane %v906_v45, 6 }
 0x154   :  { %v900_v38 = vadd.f32 %v892_v60, %v876_v47  ;;  %v915_v33 = vrot.slane %v907_v42, 6  ;;  %v916_v59 = vrot.slane %v908_v17, 6  ;;  %v929_v19 = vmul.f32 %v3059_v34, %v2316_v41 }
 0x155   :  { %v921_v4 = vadd.f32 %v913_v49, %v897_v7  ;;  %v922_v1 = vadd.f32 %v914_v63, %v898_v28  ;;  %v930_v22 = vmul.f32 %v3059_v34, %v2283_v26  ;;  %v931_v24 = vmul.f32 %v3059_v34, %v2544_v48 }
 0x156   :  { %v923_v54 = vadd.f32 %v915_v33, %v899_v35  ;;  %v924_v11 = vadd.f32 %v916_v59, %v900_v38  ;;  %v932_v3 = vmul.f32 %v3059_v34, %v2325_v46  ;;  %v937_v37 = vrot.slane %v929_v19, 7 }
 0x157   :  { %v938_v47 = vrot.slane %v930_v22, 7  ;;  %v939_v2 = vrot.slane %v931_v24, 7  ;;  %v1053_v6 = vadd.f32 %v1045_v10, %v2664_v43  ;;  %v1054_v53 = vadd.f32 %v1046_v21, %v2666_v61 }
 0x158   :  { %v940_v9 = vrot.slane %v932_v3, 7  ;;  %v945_v14 = vadd.f32 %v937_v37, %v921_v4  ;;  %v1055_v45 = vadd.f32 %v1047_v12, %v2668_v51  ;;  %v1056_v60 = vadd.f32 %v1048_v8, %v2670_v55  ;;  %v3064_v3 = vld [vmem:[#allocation22_spill] sm:$0xff] }
 0x159   :  { %v2827_v7 = vmul.f32 0.35355338, %v2763_v52  ;;  %v946_v42 = vadd.f32 %v938_v47, %v922_v1  ;;  %v947_v44 = vadd.f32 %v939_v2, %v923_v54  ;;  %v1077_v43 = vadd.f32 %v1069_v13, %v1053_v6  ;;  %v3066_v2 = vld [vmem:[#allocation28_spill] sm:$0xff] }
 0x15a   :  { %v948_v16 = vadd.f32 %v940_v9, %v924_v11  ;;  %v2831_v61 = vmul.f32 0.35355338, %v945_v14  ;;  %v1078_v10 = vadd.f32 %v1070_v62, %v1054_v53  ;;  %v3060_v50 = vrot.slane %v2698_v25, 5  ;;  %v3063_v11 = vld [vmem:[#allocation27_spill] sm:$0xff] }
 0x15b   :  { %v2837_v21 = vmul.f32 0.35355338, %v946_v42  ;;  %v3061_v15 = vrot.slane %v2701_v27, 5  ;;  %v1085_v12 = vmul.f32 %v2680_v39, %v2316_v41  ;;  %v1086_v8 = vmul.f32 %v2680_v39, %v2283_v26  ;;  %v3070_v42 = vld [vmem:[#allocation30_spill] sm:$0xff] }
 0x15c   :  { %v1079_v51 = vadd.f32 %v3060_v50, %v1055_v45  ;;  %v2845_v29 = vmul.f32 0.35355338, %v947_v44  ;;  %v1087_v23 = vmul.f32 %v2680_v39, %v2544_v48  ;;  %v1088_v25 = vmul.f32 %v2680_v39, %v2325_v46  ;;  %v3071_v44 = vld [vmem:[#allocation24_spill] sm:$0xff] }
 0x15d   :  { %v1080_v55 = vadd.f32 %v3061_v15, %v1056_v60  ;;  %v1109_v13 = vmul.f32 %v2684_v0, %v2316_v41  ;;  %v1093_v62 = vrot.slane %v1085_v12, 6  ;;  %v1094_v27 = vrot.slane %v1086_v8, 6  ;;  %v3074_v12 = vld [vmem:[#allocation25_spill] sm:$0xff] }
 0x15e   :  { %v1110_v52 = vmul.f32 %v2684_v0, %v2283_v26  ;;  %v1111_v17 = vmul.f32 %v2684_v0, %v2544_v48  ;;  %v1095_v28 = vrot.slane %v1087_v23, 6  ;;  %v1096_v35 = vrot.slane %v1088_v25, 6  ;;  %v3076_v25 = vld [vmem:[#allocation26_spill] sm:$0xff] }
 0x15f   :  { %v1112_v49 = vmul.f32 %v2684_v0, %v2325_v46  ;;  %v1117_v63 = vrot.slane %v1109_v13, 7  ;;  %v1101_v38 = vadd.f32 %v1093_v62, %v1077_v43  ;;  %v1102_v33 = vadd.f32 %v1094_v27, %v1078_v10  ;;  %v3067_v0 = vld [vmem:[#allocation23_spill] sm:$0xff]  ;;  %v3078_v62 = vld [vmem:[#allocation29_spill] sm:$0xff] }
 0x160   :  { %v1118_v39 = vrot.slane %v1110_v52, 7  ;;  %v1119_v59 = vrot.slane %v1111_v17, 7  ;;  %v1103_v34 = vadd.f32 %v1095_v28, %v1079_v51  ;;  %v1104_v19 = vadd.f32 %v1096_v35, %v1080_v55 }
 0x161   :  { %v1120_v4 = vrot.slane %v1112_v49, 7  ;;  %v3062_v1 = vrot.slane %v2604_v58, 1  ;;  %v1125_v24 = vadd.f32 %v1117_v63, %v1101_v38  ;;  %v3065_v37 = vrot.slane %v3064_v3, 5 }
 0x162   :  { %v1126_v54 = vadd.f32 %v1118_v39, %v1102_v33  ;;  %v3068_v6 = vrot.slane %v3067_v0, 5  ;;  %v1127_v9 = vadd.f32 %v1119_v59, %v1103_v34  ;;  %v3069_v45 = vrot.slane %v2608_v30, 2 }
 0x163   :  { %v1163_v22 = vadd.f32 %v3062_v1, %v2600_v57  ;;  %v1257_v47 = vadd.f32 %v3065_v37, %v3063_v11  ;;  %v1128_v14 = vadd.f32 %v1120_v4, %v1104_v19  ;;  %v3072_v43 = vrot.slane %v3071_v44, 5 }
 0x164   :  { %v1258_v53 = vadd.f32 %v3068_v6, %v3066_v2  ;;  %v952_v57 = vmul.f32 0.35355338, %v948_v16  ;;  %v2873_v10 = vmul.f32 0.35355338, %v1125_v24  ;;  %v2875_v50 = vmul.f32 0.35355338, %v1126_v54 }
 0x165   :  { %v1187_v60 = vadd.f32 %v3069_v45, %v1163_v22  ;;  %v1260_v58 = vadd.f32 %v3072_v43, %v3070_v42  ;;  %v2877_v51 = vmul.f32 0.35355338, %v1127_v9  ;;  %v3073_v15 = vrot.slane %v2612_v31, 3  ;;  %v3080_v16 = vld [vmem:[#allocation31_spill] sm:$0xff] }
 0x166   :  { %v3075_v8 = vrot.slane %v3074_v12, 6  ;;  %v3077_v30 = vrot.slane %v3076_v25, 6  ;;  %v3079_v27 = vrot.slane %v3078_v62, 6  ;;  %v1289_v17 = vmul.f32 %v3080_v16, %v2316_v41 }
 0x167   :  { %v1211_v55 = vadd.f32 %v3073_v15, %v1187_v60  ;;  %v1290_v28 = vmul.f32 %v3080_v16, %v2283_v26  ;;  %v1292_v35 = vmul.f32 %v3080_v16, %v2325_v46  ;;  %v2893_v31 = vmul.f32 0.35355338, %v1128_v14 }
 0x168   :  { %v1281_v23 = vadd.f32 %v3075_v8, %v1257_v47  ;;  %v1282_v13 = vadd.f32 %v3077_v30, %v1258_v53  ;;  %v1284_v52 = vadd.f32 %v3079_v27, %v1260_v58  ;;  %v3081_v49 = vrot.slane %v2616_v32, 4 }
 0x169   :  { %v1291_v38 = vmul.f32 %v3080_v16, %v2544_v48  ;;  %v1313_v33 = vmax.f32 %v2765_v56, %v2831_v61  ;;  %v1297_v39 = vrot.slane %v1289_v17, 7  ;;  %v1298_v59 = vrot.slane %v1290_v28, 7 }
 0x16a   :  { %v1235_v63 = vadd.f32 %v3081_v49, %v1211_v55  ;;  %v1300_v41 = vrot.slane %v1292_v35, 7  ;;  %v1314_v26 = vmax.f32 %v2769_v36, %v2837_v21  ;;  %v3082_v34 = vrot.slane %v2658_v40, 5 }
 0x16b   :  { %v1315_v19 = vmax.f32 %v2775_v5, %v2845_v29  ;;  %v1316_v32 = vmax.f32 %v2827_v7, %v952_v57  ;;  %v1317_v4 = vmax.f32 %v1313_v33, %v2873_v10  ;;  %v1305_v48 = vadd.f32 %v1297_v39, %v1281_v23 }
 0x16c   :  { %v1259_v46 = vadd.f32 %v3082_v34, %v1235_v63  ;;  %v1306_v1 = vadd.f32 %v1298_v59, %v1282_v13  ;;  %v1308_v22 = vadd.f32 %v1300_v41, %v1284_v52  ;;  %v1318_v24 = vmax.f32 %v1314_v26, %v2875_v50 }
 0x16d   :  { %v1299_v11 = vrot.slane %v1291_v38, 7  ;;  %v1320_v3 = vmax.f32 %v1316_v32, %v2893_v31  ;;  %v1309_v40 = vmul.f32 0.35355338, %v1305_v48  ;;  %v1319_v0 = vmax.f32 %v1315_v19, %v2877_v51 }
 0x16e   :  { %v1283_v54 = vadd.f32 %v1275_v18, %v1259_v46  ;;  %v1310_v37 = vmul.f32 0.35355338, %v1306_v1  ;;  %v1312_v47 = vmul.f32 0.35355338, %v1308_v22 }
 0x16f   :  { %v1321_v6 = vmax.f32 %v1317_v4, %v1309_v40 }
 0x170   :  { %v1307_v2 = vadd.f32 %v1299_v11, %v1283_v54  ;;  %v1322_v53 = vmax.f32 %v1318_v24, %v1310_v37  ;;  %v1324_v9 = vmax.f32 %v1320_v3, %v1312_v47 }
 0x171   :  { %v1325_v45 = vsub.f32 %v2765_v56, %v1321_v6  ;;  %v1337_v18 = vsub.f32 %v2831_v61, %v1321_v6  ;;  %v1349_v56 = vsub.f32 %v2873_v10, %v1321_v6 }
 0x172   :  { %v1311_v14 = vmul.f32 0.35355338, %v1307_v2  ;;  %v1326_v60 = vsub.f32 %v2769_v36, %v1322_v53  ;;  %v1328_v20 = vsub.f32 %v2827_v7, %v1324_v9  ;;  %v1338_v44 = vsub.f32 %v2837_v21, %v1322_v53 }
 0x173   :  { %v1329_v43 = vmul.f32 1.442695, %v1325_v45  ;;  %v1340_v8 = vsub.f32 %v952_v57, %v1324_v9  ;;  %v1341_v23 = vmul.f32 1.442695, %v1337_v18  ;;  %v1350_v61 = vsub.f32 %v2875_v50, %v1322_v53 }
 0x174   :  { %v1323_v42 = vmax.f32 %v1319_v0, %v1311_v14  ;;  %v1331_v58 = vmul.f32 1.442695, %v1326_v60  ;;  %v1335_v15 = vmul.f32 1.442695, %v1328_v20  ;;  %v1343_v7 = vmul.f32 1.442695, %v1338_v44 }
 0x175   :  { %1817 = vpow2.f32 %v1329_v43  ;;  %v1347_v30 = vmul.f32 1.442695, %v1340_v8  ;;  %v1361_v57 = vsub.f32 %v1309_v40, %v1321_v6  ;;  %v1355_v13 = vmul.f32 1.442695, %v1350_v61 }
 0x176   :  { %v1327_v55 = vsub.f32 %v2775_v5, %v1323_v42  ;;  %v1339_v12 = vsub.f32 %v2845_v29, %v1323_v42  ;;  %1819 = vpow2.f32 %v1331_v58  ;;  %v1351_v21 = vsub.f32 %v2877_v51, %v1323_v42  ;;  %v1775_v58 = vpop.f32.mrf.mxu0 }
 0x177   :  { %1821 = vpow2.f32 %v1335_v15  ;;  %v1352_v5 = vsub.f32 %v2893_v31, %v1324_v9  ;;  %v1353_v29 = vmul.f32 1.442695, %v1349_v56  ;;  %v1362_v62 = vsub.f32 %v1310_v37, %v1322_v53 }
 0x178   :  { %v1333_v36 = vmul.f32 1.442695, %v1327_v55  ;;  %v1345_v25 = vmul.f32 1.442695, %v1339_v12  ;;  %v1357_v10 = vmul.f32 1.442695, %v1351_v21  ;;  %v1363_v27 = vsub.f32 %v1311_v14, %v1323_v42  ;;  %v436_v14 = vpop.permute.xlu1 %435  ;;  %v431_v42 = vpop.permute.xlu0 %430 }
 0x179   :  { %v1359_v52 = vmul.f32 1.442695, %v1352_v5  ;;  %v1364_v50 = vsub.f32 %v1312_v47, %v1324_v9  ;;  %v1365_v16 = vmul.f32 1.442695, %v1361_v57  ;;  %v1367_v51 = vmul.f32 1.442695, %v1362_v62  ;;  %v1778_v12 = vpop.f32.mrf.mxu1  ;;  %v574_v62 = vpop.f32.mrf.mxu0 }
 0x17a   :  { %1823 = vpow2.f32 %v1333_v36  ;;  %v1369_v17 = vmul.f32 1.442695, %v1363_v27  ;;  %v580_v61 = vadd.f32 %v1775_v58, %v436_v14 }
 0x17b   :  { %1825 = vpow2.f32 %v1341_v23  ;;  %v1371_v28 = vmul.f32 1.442695, %v1364_v50 }
 0x17c   :  { %1827 = vpow2.f32 %v1343_v7  ;;  %v446_v7 = vpop.permute.xlu1 %445 }
 0x17d   :  { %1829 = vpow2.f32 %v1345_v25  ;;  %v590_v57 = vadd.f32 %v1778_v12, %v446_v7 }
 0x17e   :  { %1831 = vpow2.f32 %v1347_v30 }
 0x17f   :  { %1833 = vpow2.f32 %v1353_v29 }
 0x180   :  { %1835 = vpow2.f32 %v1355_v13 }
 0x181   :  { %1837 = vpow2.f32 %v1357_v10  ;;  %v584_v10 = vpop.f32.mrf.mxu1 }
 0x182   :  { %1839 = vpow2.f32 %v1359_v52  ;;  %v2925_v35 = vpop.eup %1817  ;;  %v3083_v52 = vld [vmem:[#allocation5_spill] sm:$0xff] }
 0x183   :  { %1841 = vpow2.f32 %v1365_v16  ;;  %v2927_v31 = vpop.eup %1819 }
 0x184   :  { %1843 = vpow2.f32 %v1367_v51  ;;  %v2929_v49 = vpop.eup %1821 }
 0x185   :  { %1845 = vpow2.f32 %v1369_v17  ;;  %v441_v17 = vpop.permute.xlu0 %440 }
 0x186   :  { %1847 = vpow2.f32 %v1371_v28 }
 0x187   :  { %v2931_v63 = vpop.eup %1823 }
 0x188   :  { %v1826_v38 = vpop.eup %1825 }
 0x189   :  { %v1828_v33 = vpop.eup %1827  ;;  %v1373_v39 = vadd.f32 %v1826_v38, %v2925_v35 }
 0x18a   :  { %v1830_v59 = vpop.eup %1829  ;;  %v1374_v41 = vadd.f32 %v1828_v33, %v2927_v31 }
 0x18b   :  { %v1832_v26 = vpop.eup %1831  ;;  %v1375_v34 = vadd.f32 %v1830_v59, %v2931_v63 }
 0x18c   :  { %v2936_v46 = vpop.eup %1833  ;;  %v1376_v19 = vadd.f32 %v1832_v26, %v2929_v49 }
 0x18d   :  { %v2939_v32 = vpop.eup %1835  ;;  %v1377_v4 = vadd.f32 %v2936_v46, %v1373_v39 }
 0x18e   :  { %v2942_v48 = vpop.eup %1837  ;;  %v1378_v1 = vadd.f32 %v2939_v32, %v1374_v41 }
 0x18f   :  { %v2945_v22 = vpop.eup %1839  ;;  %v1379_v24 = vadd.f32 %v2942_v48, %v1375_v34 }
 0x190   :  { %v1842_v54 = vpop.eup %1841  ;;  %v1380_v11 = vadd.f32 %v2945_v22, %v1376_v19  ;;  %v575_v19 = vadd.f32 %v574_v62, %v431_v42 }
 0x191   :  { %v1844_v3 = vpop.eup %1843  ;;  %v1381_v40 = vadd.f32 %v1842_v54, %v1377_v4  ;;  %v585_v4 = vadd.f32 %v584_v10, %v441_v17 }
 0x192   :  { %v1846_v37 = vpop.eup %1845  ;;  %v1382_v47 = vadd.f32 %v1844_v3, %v1378_v1 }
 0x193   :  { %v1848_v2 = vpop.eup %1847  ;;  %v1383_v0 = vadd.f32 %v1846_v37, %v1379_v24  ;;  %1849 = vrcp.f32 %v1381_v40 }
 0x194   :  { %v1384_v6 = vadd.f32 %v1848_v2, %v1380_v11  ;;  %1851 = vrcp.f32 %v1382_v47 }
 0x195   :  { %1853 = vrcp.f32 %v1383_v0 }
 0x196   :  { %1855 = vrcp.f32 %v1384_v6 }
 0x1a0   :  { %v1850_v53 = vpop.eup %1849 }
 0x1a1   :  { %v1852_v9 = vpop.eup %1851  ;;  %v1389_v45 = vmul.f32 %v1850_v53, %v1381_v40 }
 0x1a2   :  { %v1854_v60 = vpop.eup %1853  ;;  %v1390_v20 = vmul.f32 %v1852_v9, %v1382_v47 }
 0x1a3   :  { %v1856_v18 = vpop.eup %1855  ;;  %v1391_v44 = vmul.f32 %v1854_v60, %v1383_v0  ;;  %v1393_v43 = vsub.f32 2.0, %v1389_v45 }
 0x1a4   :  { %v1392_v15 = vmul.f32 %v1856_v18, %v1384_v6  ;;  %v1394_v55 = vsub.f32 2.0, %v1390_v20 }
 0x1a5   :  { %v1395_v8 = vsub.f32 2.0, %v1391_v44  ;;  %v1397_v23 = vmul.f32 %v1850_v53, %v1393_v43 }
 0x1a6   :  { %v1396_v56 = vsub.f32 2.0, %v1392_v15  ;;  %v1398_v36 = vmul.f32 %v1852_v9, %v1394_v55 }
 0x1a7   :  { %v1399_v25 = vmul.f32 %v1854_v60, %v1395_v8  ;;  %v1425_v21 = vmul.f32 %v1826_v38, %v1397_v23  ;;  %v1481_v30 = vmul.f32 %v1842_v54, %v1397_v23  ;;  %v1401_v51 = vmul.f32 %v2925_v35, %v1397_v23 }
 0x1a8   :  { %v1400_v5 = vmul.f32 %v1856_v18, %v1396_v56  ;;  %v1426_v29 = vmul.f32 %v1828_v33, %v1398_v36  ;;  %v1482_v13 = vmul.f32 %v1844_v3, %v1398_v36  ;;  %v1402_v38 = vmul.f32 %v2927_v31, %v1398_v36 }
 0x1a9   :  { %v1427_v27 = vmul.f32 %v1830_v59, %v1399_v25  ;;  %v1432_v50 = vrot.slane %v1425_v21, %v3083_v52  ;;  %v1483_v16 = vmul.f32 %v1846_v37, %v1399_v25  ;;  %v1488_v33 = vrot.slane %v1481_v30, %v3083_v52 }
 0x1aa   :  { %v1428_v28 = vmul.f32 %v1832_v26, %v1400_v5  ;;  %v1436_v39 = vrot.slane %v1426_v29, %v3083_v52  ;;  %v1484_v41 = vmul.f32 %v1848_v2, %v1400_v5  ;;  %v1492_v24 = vrot.slane %v1482_v13, %v3083_v52 }
 0x1ab   :  { %v1440_v34 = vrot.slane %v1427_v27, %v3083_v52  ;;  %v1445_v1 = vmul.f32 %v1432_v50, %v580_v61  ;;  %v1496_v35 = vrot.slane %v1483_v16, %v3083_v52  ;;  %v1403_v11 = vmul.f32 %v2931_v63, %v1399_v25 }
 0x1ac   :  { %v1444_v59 = vrot.slane %v1428_v28, %v3083_v52  ;;  %v1446_v54 = vmul.f32 %v1436_v39, %v580_v61  ;;  %v1500_v26 = vrot.slane %v1484_v41, %v3083_v52  ;;  %v1404_v31 = vmul.f32 %v2929_v49, %v1400_v5 }
 0x1ad   :  { %v1447_v3 = vmul.f32 %v1440_v34, %v580_v61  ;;  %v1408_v37 = vrot.slane %v1401_v51, %v3083_v52  ;;  %v1412_v47 = vrot.slane %v1402_v38, %v3083_v52  ;;  %v1416_v2 = vrot.slane %v1403_v11, %v3083_v52 }
 0x1ae   :  { %v1448_v40 = vmul.f32 %v1444_v59, %v580_v61  ;;  %v1420_v0 = vrot.slane %v1404_v31, %v3083_v52  ;;  %v1453_v6 = vmul.f32 %v2936_v46, %v1397_v23  ;;  %v1454_v53 = vmul.f32 %v2939_v32, %v1398_v36 }
 0x1af   :  { %v1421_v9 = vmul.f32 %v1408_v37, %v575_v19  ;;  %v1422_v14 = vmul.f32 %v1412_v47, %v575_v19  ;;  %v1455_v63 = vmul.f32 %v2942_v48, %v1399_v25  ;;  %v1456_v49 = vmul.f32 %v2945_v22, %v1400_v5 }
 0x1b0   :  { %v1423_v45 = vmul.f32 %v1416_v2, %v575_v19  ;;  %v1424_v60 = vmul.f32 %v1420_v0, %v575_v19  ;;  %v1460_v20 = vrot.slane %v1453_v6, %v3083_v52  ;;  %v1464_v18 = vrot.slane %v1454_v53, %v3083_v52 }
 0x1b1   :  { %v1449_v42 = vadd.f32 %v1445_v1, %v1421_v9  ;;  %v1450_v44 = vadd.f32 %v1446_v54, %v1422_v14  ;;  %v1468_v43 = vrot.slane %v1455_v63, %v3083_v52  ;;  %v1472_v46 = vrot.slane %v1456_v49, %v3083_v52 }
 0x1b2   :  { %v1451_v58 = vadd.f32 %v1447_v3, %v1423_v45  ;;  %v1452_v32 = vadd.f32 %v1448_v40, %v1424_v60  ;;  %v1473_v15 = vmul.f32 %v1460_v20, %v585_v4  ;;  %v1474_v55 = vmul.f32 %v1464_v18, %v585_v4 }
 0x1b3   :  { %v1475_v12 = vmul.f32 %v1468_v43, %v585_v4  ;;  %v1476_v48 = vmul.f32 %v1472_v46, %v585_v4  ;;  %v1501_v8 = vmul.f32 %v1488_v33, %v590_v57  ;;  %v1502_v22 = vmul.f32 %v1492_v24, %v590_v57 }
 0x1b4   :  { %v1477_v23 = vadd.f32 %v1473_v15, %v1449_v42  ;;  %v1478_v56 = vadd.f32 %v1474_v55, %v1450_v44  ;;  %v1503_v36 = vmul.f32 %v1496_v35, %v590_v57  ;;  %v1504_v7 = vmul.f32 %v1500_v26, %v590_v57 }
 0x1b5   :  { %v1479_v61 = vadd.f32 %v1475_v12, %v1451_v58  ;;  %v1480_v25 = vadd.f32 %v1476_v48, %v1452_v32 }
 0x1b6   :  { %v1505_v21 = vadd.f32 %v1501_v8, %v1477_v23  ;;  %v1506_v30 = vadd.f32 %v1502_v22, %v1478_v56 }
 0x1b7   :  { %v1507_v5 = vadd.f32 %v1503_v36, %v1479_v61  ;;  %v1508_v29 = vadd.f32 %v1504_v7, %v1480_v25 }
 0x1b8   :  { %1509 = vst [vmem:[#allocation2] sm:$0xff] %v1505_v21  ;;  %1510 = vst [vmem:[#allocation2 + $0x8] sm:$0xff] %v1506_v30 }
 0x1b9   :  { %1511 = vst [vmem:[#allocation2 + $0x10] sm:$0xff] %v1507_v5  ;;  %1512 = vst [vmem:[#allocation2 + $0x18] sm:$0xff] %v1508_v29 }
 0x1ba   :  { %1868 = shalt.err (!%p1865_p4)
}
 0x1bb   :  { %s1881_s6 = smov 128   ;;  %s1882_s7 = smov 8  }
 0x1bc   :  { %1524 = dma.vmem_to_hbm [thread:$0]  %s1519_s3, 512, %s2981_s5, [#allocation3], %s1881_s6, %s1881_s6, %s1882_s7  }
 0x1bd   :  { %1877 = dma.done.wait [#allocation3], 512  }
 0x1be   :  { %1878 = vsyncadd [#allocation3], 4294966784 }
 0x1bf   :  { %1528 = vsyncpa [#allocation3], 1 }

</bundles_post_ra>
